<compile_context>
chip_gen: v7x
topology: tpu7x:2x2x1
jax: 0.10.0
libtpu: 0.0.40
codegen_flags: <defaults>
</compile_context>

<pallas_src>
import functools

import jax
import jax.numpy as jnp
from jax.experimental import pallas as pl
from jax.experimental.pallas import tpu as pltpu


def encoder_layer_kernel(x_ref, wq_ref, bq_ref, wkv_ref, bkv_ref, wo_ref, bo_ref,
                         w1_ref, b1_ref, w2_ref, b2_ref, gamma_ref, beta_ref,
                         out_ref, kv_ref, q_ref, o_ref,
                         *, n_head, head_dim, tile_s, s_valid):
    s_idx = pl.program_id(1)
    S, D = x_ref.shape            # padded sequence length, model dim
    cdt = wq_ref.dtype            # bf16 compute dtype for MXU operands

    # ---- K/V projection for the whole (padded) sequence: once per batch element,
    #      kept resident in VMEM scratch across the "arbitrary" query-tile axis ----
    # TODO(synk): flash-style KV tiling would remove this cold, un-overlapped matmul burst.
    @pl.when(s_idx == 0)
    def _():
        kv = jnp.dot(x_ref[...], wkv_ref[...],
                     preferred_element_type=jnp.float32) + bkv_ref[...]
        kv_ref[...] = kv.astype(kv_ref.dtype)

    # ---- Q projection for this tile of query rows (scale already folded into wq/bq) ----
    row0 = pl.multiple_of(s_idx * tile_s, tile_s)
    x_tile = x_ref[pl.ds(row0, tile_s), :]
    q = jnp.dot(x_tile, wq_ref[...], preferred_element_type=jnp.float32) + bq_ref[...]
    q_ref[...] = q.astype(cdt)

    # ---- key-padding mask bias: static branch, zero cost when S was not padded ----
    if s_valid < S:
        key_ids = jax.lax.broadcasted_iota(jnp.int32, (1, S), 1)
        mask_bias = jnp.where(key_ids < s_valid, 0.0, -1e30)
    else:
        mask_bias = None

    # ---- per-head attention: scores / softmax / PV, writing PV into the o scratch slab ----
    def attend(lo):
        qh = q_ref[:, pl.ds(lo, head_dim)]
        kh = kv_ref[:, pl.ds(lo, head_dim)]
        vh = kv_ref[:, pl.ds(D + lo, head_dim)]
        s = jax.lax.dot_general(qh, kh, (((1,), (1,)), ((), ())),
                                preferred_element_type=jnp.float32)      # (tile_s, S)
        if mask_bias is not None:
            s = s + mask_bias
        s = s - jnp.max(s, axis=-1, keepdims=True)
        p = jnp.exp(s)
        # TODO(synk): if EUP-bound on v6e/v7x (long S), compute exp on bf16 scores.
        p = p * pl.reciprocal(jnp.sum(p, axis=-1, keepdims=True), approx=True)
        pv = jnp.dot(p.astype(cdt), vh, preferred_element_type=jnp.float32)
        o_ref[:, pl.ds(lo, head_dim)] = pv.astype(o_ref.dtype)

    if head_dim % 128 == 0:
        # Lane-aligned heads: fori_loop bounds live ranges to one head's temporaries.
        def body(h, carry):
            attend(pl.multiple_of(h * head_dim, head_dim))
            return carry
        jax.lax.fori_loop(0, n_head, body, 0)
    else:
        # head_dim < 128: static offsets avoid dynamic sub-128 lane slices.
        # TODO(synk): head-major K/V scratch layout for head_dim < 128 production models.
        for h in range(n_head):
            attend(h * head_dim)

    # ---- fused output projection on the lane-concatenated head outputs ----
    attn = jnp.dot(o_ref[...], wo_ref[...], preferred_element_type=jnp.float32) + bo_ref[...]

    # ---- position-wise feed-forward ----
    h1 = jnp.dot(attn.astype(cdt), w1_ref[...],
                 preferred_element_type=jnp.float32) + b1_ref[...]
    h1 = jnp.maximum(h1, 0.0)
    ff = jnp.dot(h1.astype(cdt), w2_ref[...],
                 preferred_element_type=jnp.float32) + b2_ref[...]

    # residual = attention output, then a single LayerNorm (matches the PyTorch module);
    # dropout = identity.
    y = ff + attn
    mu = jnp.mean(y, axis=-1, keepdims=True)
    var = jnp.mean((y - mu) ** 2, axis=-1, keepdims=True)
    out = (y - mu) * jax.lax.rsqrt(var + 1e-6) * gamma_ref[...] + beta_ref[...]
    out_ref[...] = out.astype(out_ref.dtype)


def _round_up(a, b):
    return -(-a // b) * b


def encoder_layer(x, params, n_head):
    B, S, D = x.shape
    head_dim = D // n_head
    H = params["w1"].shape[-1]
    cdt = params["wq"].dtype
    out_itemsize = int(jnp.dtype(x.dtype).itemsize)

    weights = (params["wq"], params["bq"], params["wkv"], params["bkv"],
               params["wo"], params["bo"], params["w1"], params["b1"],
               params["w2"], params["b2"], params["gamma"], params["beta"])

    def _bytes(a):
        return int(a.size) * int(jnp.dtype(a.dtype).itemsize)
    weight_bytes = sum(_bytes(a) for a in weights)

    # ---- physical VMEM / generation detection ----
    try:
        phys_vmem = int(pltpu.get_tpu_info().vmem_capacity_bytes)
    except Exception:
        phys_vmem = 64 * 2 ** 20
    try:
        kind = jax.devices()[0].device_kind.lower()
    except Exception:
        kind = ""
    old_gen = any(v in kind for v in ("v2", "v3", "v4", "v5"))   # 128x128-class MXU
    vmem_cap = int(phys_vmem * 0.85)          # ~108 MiB on v5e/v6e, ~54 MiB on v7x

    def need_bytes(tile, s_pad):
        x_block = 2 * s_pad * D * 2                       # bf16 x, double-buffered
        out_block = 2 * tile * D * out_itemsize
        scratch = s_pad * 2 * D * 2 + 2 * tile * D * 2    # kv + q + per-head o (bf16)
        temps = 4 * (2 * tile * s_pad + tile * H + 6 * tile * D)
        return weight_bytes + x_block + out_block + scratch + temps   # weights single-buffered

    # ---- query-row tile: 256/512 fills a v6e/v7x MXU pass, 128 on v5-and-older;
    #      non-multiple S is padded up (and the padded keys masked) instead of one giant tile
    candidates = (128,) if old_gen else (512, 256, 128)
    if S <= max(candidates):
        tile_s, s_pad = S, S                      # single full-dim tile
    else:
        tile_s = 128
        for cand in candidates:
            if cand <= S and need_bytes(cand, _round_up(S, cand)) <= vmem_cap:
                tile_s = cand
                break
        s_pad = _round_up(S, tile_s)
    n_s = s_pad // tile_s

    need = need_bytes(tile_s, s_pad)
    vmem_limit = int(min(max(int(1.3 * need), 32 * 2 ** 20), vmem_cap))

    # ---- bf16 input at the call boundary (+ sequence padding if needed) ----
    x_in = x.astype(cdt)
    if s_pad != S:
        x_in = jnp.pad(x_in, ((0, 0), (0, s_pad - S), (0, 0)))

    # ---- advisory cost estimate ----
    flops = int(2 * B * s_pad * (4 * D * D + 2 * D * H + 2 * s_pad * D))
    transcendentals = int(B * n_head * s_pad * s_pad + 2 * B * s_pad)
    bytes_accessed = int(B * s_pad * D * (2 + out_itemsize) + weight_bytes)

    x_single_buffer = phys_vmem <= 64 * 2 ** 20   # v7x-class: every MiB matters

    def build(use_pipeline_mode):
        def const_spec(a):
            nd = a.ndim
            if use_pipeline_mode:
                return pl.BlockSpec(a.shape, lambda b, s, nd=nd: (0,) * nd,
                                    pipeline_mode=pl.Buffered(1))
            return pl.BlockSpec(a.shape, lambda b, s, nd=nd: (0,) * nd)

        if use_pipeline_mode and x_single_buffer:
            x_spec = pl.BlockSpec((None, s_pad, D), lambda b, s: (b, 0, 0),
                                  pipeline_mode=pl.Buffered(1))
        else:
            x_spec = pl.BlockSpec((None, s_pad, D), lambda b, s: (b, 0, 0))

        in_specs = [x_spec] + [const_spec(a) for a in weights]
        out_spec = pl.BlockSpec((None, tile_s, D), lambda b, s: (b, s, 0))

        grid_spec = pltpu.PrefetchScalarGridSpec(
            num_scalar_prefetch=0,
            grid=(B, n_s),
            in_specs=in_specs,
            out_specs=out_spec,
            scratch_shapes=[pltpu.VMEM((s_pad, 2 * D), cdt),   # resident K|V
                            pltpu.VMEM((tile_s, D), cdt),      # Q tile
                            pltpu.VMEM((tile_s, D), cdt)])     # per-head PV slab

        kernel = functools.partial(encoder_layer_kernel, n_head=n_head,
                                   head_dim=head_dim, tile_s=tile_s, s_valid=S)
        return pl.pallas_call(
            kernel,
            out_shape=jax.ShapeDtypeStruct((B, s_pad, D), x.dtype),
            grid_spec=grid_spec,
            compiler_params=pltpu.CompilerParams(
                # TODO(synk): on v7x with small B, split query tiles across cores too.
                dimension_semantics=("parallel", "arbitrary"),
                vmem_limit_bytes=vmem_limit),
            cost_estimate=pl.CostEstimate(flops=flops, transcendentals=transcendentals,
                                          bytes_accessed=bytes_accessed),
        )

    try:
        out = build(True)(x_in, *weights)
    except Exception:
        # Fallback for jax builds without BlockSpec(pipeline_mode=...) support.
        out = build(False)(x_in, *weights)

    if s_pad != S:
        out = out[:, :S, :]
    return out


def init_params(key, d_model, n_head, d_hidden, compute_dtype=jnp.bfloat16):
    ks = jax.random.split(key, 8)
    s_in = 1.0 / (d_model ** 0.5)
    s_hid = 1.0 / (d_hidden ** 0.5)
    head_dim = d_model // n_head
    qk_scale = 1.0 / (head_dim ** 0.5)   # folded into wq/bq (one-time parameter transform)
    wq = jax.random.normal(ks[0], (d_model, d_model), jnp.float32) * s_in
    wk = jax.random.normal(ks[1], (d_model, d_model), jnp.float32) * s_in
    wv = jax.random.normal(ks[2], (d_model, d_model), jnp.float32) * s_in
    wo = jax.random.normal(ks[3], (d_model, d_model), jnp.float32) * s_in
    w1 = jax.random.normal(ks[4], (d_model, d_hidden), jnp.float32) * s_in
    w2 = jax.random.normal(ks[5], (d_hidden, d_model), jnp.float32) * s_hid
    return {
        # fused layouts: Q alone (scale folded in), K|V concatenated along output columns
        "wq": (wq * qk_scale).astype(compute_dtype),
        "bq": (jax.random.normal(ks[6], (1, d_model), jnp.float32) * 0.02) * qk_scale,
        "wkv": jnp.concatenate([wk, wv], axis=1).astype(compute_dtype),
        "bkv": jax.random.normal(ks[7], (1, 2 * d_model), jnp.float32) * 0.02,
        "wo": wo.astype(compute_dtype),
        "bo": jnp.zeros((1, d_model), jnp.float32),
        "w1": w1.astype(compute_dtype),
        "b1": jnp.full((1, d_hidden), 0.01, jnp.float32),
        "w2": w2.astype(compute_dtype),
        "b2": jnp.full((1, d_model), -0.01, jnp.float32),
        "gamma": jnp.ones((1, d_model), jnp.float32),
        "beta": jnp.zeros((1, d_model), jnp.float32),
    }


def reference(x, params, n_head):
    """Pure-JAX reference mirroring the kernel's mixed-precision cast points."""
    B, S, D = x.shape
    hd = D // n_head
    cdt = params["wq"].dtype
    xc = x.astype(cdt)

    q = (jnp.dot(xc, params["wq"], preferred_element_type=jnp.float32)
         + params["bq"]).astype(cdt)
    kv = (jnp.dot(xc, params["wkv"], preferred_element_type=jnp.float32)
          + params["bkv"]).astype(cdt)

    heads = []
    for h in range(n_head):
        lo = h * hd
        qh = q[..., lo:lo + hd]
        kh = kv[..., lo:lo + hd]
        vh = kv[..., D + lo:D + lo + hd]
        s = jnp.einsum("bqd,bkd->bqk", qh, kh, preferred_element_type=jnp.float32)
        s = s - jnp.max(s, axis=-1, keepdims=True)
        p = jnp.exp(s)
        p = p / jnp.sum(p, axis=-1, keepdims=True)
        heads.append(jnp.einsum("bqk,bkd->bqd", p.astype(cdt), vh,
                                preferred_element_type=jnp.float32))
    o = jnp.concatenate(heads, axis=-1).astype(cdt)

    attn = jnp.dot(o, params["wo"], preferred_element_type=jnp.float32) + params["bo"]
    h1 = jnp.maximum(jnp.dot(attn.astype(cdt), params["w1"],
                             preferred_element_type=jnp.float32) + params["b1"], 0.0)
    ff = jnp.dot(h1.astype(cdt), params["w2"],
                 preferred_element_type=jnp.float32) + params["b2"]
    y = ff + attn
    mu = jnp.mean(y, axis=-1, keepdims=True)
    var = jnp.mean((y - mu) ** 2, axis=-1, keepdims=True)
    return (y - mu) / jnp.sqrt(var + 1e-6) * params["gamma"] + params["beta"]


if __name__ == "__main__":
    B, S, d_model, n_head, d_hidden = 2, 8, 32, 4, 64
    key = jax.random.PRNGKey(0)
    kx, kp = jax.random.split(key)
    x = jax.random.normal(kx, (B, S, d_model), jnp.float32)
    params = init_params(kp, d_model, n_head, d_hidden)

    out = jax.block_until_ready(encoder_layer(x, params, n_head))

    ref = reference(x, params, n_head)
    assert out.shape == (B, S, d_model)
    # bf16 MXU operands + approx EUP reciprocal in the kernel -> slightly looser tolerance
    assert jnp.allclose(out, ref, atol=2e-2, rtol=2e-2), "mismatch vs pure-JAX reference"
    print("KERNEL_OK")
</pallas_src>

<mosaic_0001>
module attributes {stable_mosaic.version = 11 : i64} {
  func.func @encoder_layer_kernel(%arg0: i32, %arg1: i32, %arg2: memref<1x8x32xbf16, #tpu.memory_space<vmem>>, %arg3: memref<32x32xbf16, #tpu.memory_space<vmem>>, %arg4: memref<1x32xf32, #tpu.memory_space<vmem>>, %arg5: memref<32x64xbf16, #tpu.memory_space<vmem>>, %arg6: memref<1x64xf32, #tpu.memory_space<vmem>>, %arg7: memref<32x32xbf16, #tpu.memory_space<vmem>>, %arg8: memref<1x32xf32, #tpu.memory_space<vmem>>, %arg9: memref<32x64xbf16, #tpu.memory_space<vmem>>, %arg10: memref<1x64xf32, #tpu.memory_space<vmem>>, %arg11: memref<64x32xbf16, #tpu.memory_space<vmem>>, %arg12: memref<1x32xf32, #tpu.memory_space<vmem>>, %arg13: memref<1x32xf32, #tpu.memory_space<vmem>>, %arg14: memref<1x32xf32, #tpu.memory_space<vmem>>, %arg15: memref<1x8x32xf32, #tpu.memory_space<vmem>>, %arg16: memref<8x64xbf16, #tpu.memory_space<vmem>>, %arg17: memref<8x32xbf16, #tpu.memory_space<vmem>>, %arg18: memref<8x32xbf16, #tpu.memory_space<vmem>>) attributes {dimension_semantics = [#tpu.dimension_semantics<parallel>, #tpu.dimension_semantics<arbitrary>], iteration_bounds = array<i64: 2, 1>, scalar_prefetch = 0 : i64, scratch_operands = 3 : i64, tpu.core_type = #tpu.core_type<tc>, window_params = [{pipeline_mode = #tpu.pipeline_mode<synchronous>, transform_indices = @transform_0, window_bounds = array<i64: 1, 8, 32>}, {pipeline_mode = #tpu.pipeline_mode<synchronous>, transform_indices = @transform_1, window_bounds = array<i64: 32, 32>}, {pipeline_mode = #tpu.pipeline_mode<synchronous>, transform_indices = @transform_2, window_bounds = array<i64: 1, 32>}, {pipeline_mode = #tpu.pipeline_mode<synchronous>, transform_indices = @transform_3, window_bounds = array<i64: 32, 64>}, {pipeline_mode = #tpu.pipeline_mode<synchronous>, transform_indices = @transform_4, window_bounds = array<i64: 1, 64>}, {pipeline_mode = #tpu.pipeline_mode<synchronous>, transform_indices = @transform_5, window_bounds = array<i64: 32, 32>}, {pipeline_mode = #tpu.pipeline_mode<synchronous>, transform_indices = @transform_6, window_bounds = array<i64: 1, 32>}, {pipeline_mode = #tpu.pipeline_mode<synchronous>, transform_indices = @transform_7, window_bounds = array<i64: 32, 64>}, {pipeline_mode = #tpu.pipeline_mode<synchronous>, transform_indices = @transform_8, window_bounds = array<i64: 1, 64>}, {pipeline_mode = #tpu.pipeline_mode<synchronous>, transform_indices = @transform_9, window_bounds = array<i64: 64, 32>}, {pipeline_mode = #tpu.pipeline_mode<synchronous>, transform_indices = @transform_10, window_bounds = array<i64: 1, 32>}, {pipeline_mode = #tpu.pipeline_mode<synchronous>, transform_indices = @transform_11, window_bounds = array<i64: 1, 32>}, {pipeline_mode = #tpu.pipeline_mode<synchronous>, transform_indices = @transform_12, window_bounds = array<i64: 1, 32>}, {transform_indices = @transform_13, window_bounds = array<i64: 1, 8, 32>}]} {
    %c0_i32 = arith.constant 0 : i32
    %0 = arith.cmpi eq, %arg1, %c0_i32 : i32
    %1 = arith.extui %0 : i1 to i32
    %c0_i32_0 = arith.constant 0 : i32
    %2 = arith.cmpi ne, %1, %c0_i32_0 : i32
    scf.if %2 {
      %c0_79 = arith.constant 0 : index
      %c0_80 = arith.constant 0 : index
      %c0_81 = arith.constant 0 : index
      %135 = vector.load %arg2[%c0_79, %c0_80, %c0_81] : memref<1x8x32xbf16, #tpu.memory_space<vmem>>, vector<1x8x32xbf16>
      %136 = vector.shape_cast %135 : vector<1x8x32xbf16> to vector<8x32xbf16>
      %c0_82 = arith.constant 0 : index
      %c0_83 = arith.constant 0 : index
      %137 = vector.load %arg5[%c0_82, %c0_83] : memref<32x64xbf16, #tpu.memory_space<vmem>>, vector<32x64xbf16>
      %cst_84 = arith.constant dense<0.000000e+00> : vector<8x64xf32>
      %138 = tpu.matmul %136, %137, %cst_84 {dimension_numbers = #tpu.dot_dimension_numbers<[1], [0], [0], [1], [0, 0, 1, 1], [], []>} : vector<8x32xbf16>, vector<32x64xbf16>, vector<8x64xf32> -> vector<8x64xf32>
      %c0_85 = arith.constant 0 : index
      %c0_86 = arith.constant 0 : index
      %139 = vector.load %arg6[%c0_85, %c0_86] : memref<1x64xf32, #tpu.memory_space<vmem>>, vector<1x64xf32>
      %140 = vector.broadcast %139 : vector<1x64xf32> to vector<8x64xf32>
      %141 = arith.addf %138, %140 : vector<8x64xf32>
      %142 = arith.truncf %141 : vector<8x64xf32> to vector<8x64xbf16>
      %c0_87 = arith.constant 0 : index
      %c0_88 = arith.constant 0 : index
      %143 = vector.load %arg16[%c0_87, %c0_88] : memref<8x64xbf16, #tpu.memory_space<vmem>>, vector<8x64xbf16>
      tpu.vector_store %arg16[%c0_87, %c0_88], %142 {strides = array<i32>} : memref<8x64xbf16, #tpu.memory_space<vmem>>, vector<8x64xbf16>,
    } else {
    }
    %c8_i32 = arith.constant 8 : i32
    %3 = arith.muli %arg1, %c8_i32 : i32
    %4 = tpu.assume_multiple %3, 8 : i32
    %c0 = arith.constant 0 : index
    %5 = arith.index_cast %4 : i32 to index
    %c0_1 = arith.constant 0 : index
    %6 = vector.load %arg2[%c0, %5, %c0_1] : memref<1x8x32xbf16, #tpu.memory_space<vmem>>, vector<1x8x32xbf16>
    %7 = vector.shape_cast %6 : vector<1x8x32xbf16> to vector<8x32xbf16>
    %c0_2 = arith.constant 0 : index
    %c0_3 = arith.constant 0 : index
    %8 = vector.load %arg3[%c0_2, %c0_3] : memref<32x32xbf16, #tpu.memory_space<vmem>>, vector<32x32xbf16>
    %cst = arith.constant dense<0.000000e+00> : vector<8x32xf32>
    %9 = tpu.matmul %7, %8, %cst {dimension_numbers = #tpu.dot_dimension_numbers<[1], [0], [0], [1], [0, 0, 1, 1], [], []>} : vector<8x32xbf16>, vector<32x32xbf16>, vector<8x32xf32> -> vector<8x32xf32>
    %c0_4 = arith.constant 0 : index
    %c0_5 = arith.constant 0 : index
    %10 = vector.load %arg4[%c0_4, %c0_5] : memref<1x32xf32, #tpu.memory_space<vmem>>, vector<1x32xf32>
    %11 = vector.broadcast %10 : vector<1x32xf32> to vector<8x32xf32>
    %12 = arith.addf %9, %11 : vector<8x32xf32>
    %13 = arith.truncf %12 : vector<8x32xf32> to vector<8x32xbf16>
    %c0_6 = arith.constant 0 : index
    %c0_7 = arith.constant 0 : index
    %14 = vector.load %arg17[%c0_6, %c0_7] : memref<8x32xbf16, #tpu.memory_space<vmem>>, vector<8x32xbf16>
    tpu.vector_store %arg17[%c0_6, %c0_7], %13 {strides = array<i32>} : memref<8x32xbf16, #tpu.memory_space<vmem>>, vector<8x32xbf16>,
    %c0_8 = arith.constant 0 : index
    %c0_9 = arith.constant 0 : index
    %15 = vector.load %arg17[%c0_8, %c0_9] : memref<8x32xbf16, #tpu.memory_space<vmem>>, vector<8x8xbf16>
    %c0_10 = arith.constant 0 : index
    %c0_11 = arith.constant 0 : index
    %16 = vector.load %arg16[%c0_10, %c0_11] : memref<8x64xbf16, #tpu.memory_space<vmem>>, vector<8x8xbf16>
    %c0_12 = arith.constant 0 : index
    %c32 = arith.constant 32 : index
    %17 = vector.load %arg16[%c0_12, %c32] : memref<8x64xbf16, #tpu.memory_space<vmem>>, vector<8x8xbf16>
    %cst_13 = arith.constant dense<0.000000e+00> : vector<8x8xf32>
    %18 = tpu.matmul %15, %16, %cst_13 {dimension_numbers = #tpu.dot_dimension_numbers<[1], [1], [0], [0], [0, 0, 1, 0], [], []>} : vector<8x8xbf16>, vector<8x8xbf16>, vector<8x8xf32> -> vector<8x8xf32>
    %cst_14 = arith.constant dense<0xFF800000> : vector<8xf32>
    %19 = vector.multi_reduction <maximumf>, %18, %cst_14 [1] : vector<8x8xf32> to vector<8xf32>
    %20 = vector.shape_cast %19 : vector<8xf32> to vector<8x1xf32>
    %21 = vector.broadcast %20 : vector<8x1xf32> to vector<8x8xf32>
    %22 = arith.subf %18, %21 : vector<8x8xf32>
    %23 = math.exp %22 : vector<8x8xf32>
    %cst_15 = arith.constant dense<0.000000e+00> : vector<8xf32>
    %24 = vector.multi_reduction <add>, %23, %cst_15 [1] : vector<8x8xf32> to vector<8xf32>
    %25 = vector.shape_cast %24 : vector<8xf32> to vector<8x1xf32>
    %26 = tpu.reciprocal %25 {approx = true} : vector<8x1xf32> -> vector<8x1xf32>
    %27 = vector.broadcast %26 : vector<8x1xf32> to vector<8x8xf32>
    %28 = arith.mulf %23, %27 : vector<8x8xf32>
    %29 = arith.truncf %28 : vector<8x8xf32> to vector<8x8xbf16>
    %cst_16 = arith.constant dense<0.000000e+00> : vector<8x8xf32>
    %30 = tpu.matmul %29, %17, %cst_16 {dimension_numbers = #tpu.dot_dimension_numbers<[1], [0], [0], [1], [0, 0, 1, 1], [], []>} : vector<8x8xbf16>, vector<8x8xbf16>, vector<8x8xf32> -> vector<8x8xf32>
    %31 = arith.truncf %30 : vector<8x8xf32> to vector<8x8xbf16>
    %c0_17 = arith.constant 0 : index
    %c0_18 = arith.constant 0 : index
    %32 = vector.load %arg18[%c0_17, %c0_18] : memref<8x32xbf16, #tpu.memory_space<vmem>>, vector<8x8xbf16>
    tpu.vector_store %arg18[%c0_17, %c0_18], %31 {strides = array<i32>} : memref<8x32xbf16, #tpu.memory_space<vmem>>, vector<8x8xbf16>,
    %c0_19 = arith.constant 0 : index
    %c8 = arith.constant 8 : index
    %33 = vector.load %arg17[%c0_19, %c8] : memref<8x32xbf16, #tpu.memory_space<vmem>>, vector<8x8xbf16>
    %c0_20 = arith.constant 0 : index
    %c8_21 = arith.constant 8 : index
    %34 = vector.load %arg16[%c0_20, %c8_21] : memref<8x64xbf16, #tpu.memory_space<vmem>>, vector<8x8xbf16>
    %c0_22 = arith.constant 0 : index
    %c40 = arith.constant 40 : index
    %35 = vector.load %arg16[%c0_22, %c40] : memref<8x64xbf16, #tpu.memory_space<vmem>>, vector<8x8xbf16>
    %cst_23 = arith.constant dense<0.000000e+00> : vector<8x8xf32>
    %36 = tpu.matmul %33, %34, %cst_23 {dimension_numbers = #tpu.dot_dimension_numbers<[1], [1], [0], [0], [0, 0, 1, 0], [], []>} : vector<8x8xbf16>, vector<8x8xbf16>, vector<8x8xf32> -> vector<8x8xf32>
    %cst_24 = arith.constant dense<0xFF800000> : vector<8xf32>
    %37 = vector.multi_reduction <maximumf>, %36, %cst_24 [1] : vector<8x8xf32> to vector<8xf32>
    %38 = vector.shape_cast %37 : vector<8xf32> to vector<8x1xf32>
    %39 = vector.broadcast %38 : vector<8x1xf32> to vector<8x8xf32>
    %40 = arith.subf %36, %39 : vector<8x8xf32>
    %41 = math.exp %40 : vector<8x8xf32>
    %cst_25 = arith.constant dense<0.000000e+00> : vector<8xf32>
    %42 = vector.multi_reduction <add>, %41, %cst_25 [1] : vector<8x8xf32> to vector<8xf32>
    %43 = vector.shape_cast %42 : vector<8xf32> to vector<8x1xf32>
    %44 = tpu.reciprocal %43 {approx = true} : vector<8x1xf32> -> vector<8x1xf32>
    %45 = vector.broadcast %44 : vector<8x1xf32> to vector<8x8xf32>
    %46 = arith.mulf %41, %45 : vector<8x8xf32>
    %47 = arith.truncf %46 : vector<8x8xf32> to vector<8x8xbf16>
    %cst_26 = arith.constant dense<0.000000e+00> : vector<8x8xf32>
    %48 = tpu.matmul %47, %35, %cst_26 {dimension_numbers = #tpu.dot_dimension_numbers<[1], [0], [0], [1], [0, 0, 1, 1], [], []>} : vector<8x8xbf16>, vector<8x8xbf16>, vector<8x8xf32> -> vector<8x8xf32>
    %49 = arith.truncf %48 : vector<8x8xf32> to vector<8x8xbf16>
    %c0_27 = arith.constant 0 : index
    %c8_28 = arith.constant 8 : index
    %50 = vector.load %arg18[%c0_27, %c8_28] : memref<8x32xbf16, #tpu.memory_space<vmem>>, vector<8x8xbf16>
    tpu.vector_store %arg18[%c0_27, %c8_28], %49 {strides = array<i32>} : memref<8x32xbf16, #tpu.memory_space<vmem>>, vector<8x8xbf16>,
    %c0_29 = arith.constant 0 : index
    %c16 = arith.constant 16 : index
    %51 = vector.load %arg17[%c0_29, %c16] : memref<8x32xbf16, #tpu.memory_space<vmem>>, vector<8x8xbf16>
    %c0_30 = arith.constant 0 : index
    %c16_31 = arith.constant 16 : index
    %52 = vector.load %arg16[%c0_30, %c16_31] : memref<8x64xbf16, #tpu.memory_space<vmem>>, vector<8x8xbf16>
    %c0_32 = arith.constant 0 : index
    %c48 = arith.constant 48 : index
    %53 = vector.load %arg16[%c0_32, %c48] : memref<8x64xbf16, #tpu.memory_space<vmem>>, vector<8x8xbf16>
    %cst_33 = arith.constant dense<0.000000e+00> : vector<8x8xf32>
    %54 = tpu.matmul %51, %52, %cst_33 {dimension_numbers = #tpu.dot_dimension_numbers<[1], [1], [0], [0], [0, 0, 1, 0], [], []>} : vector<8x8xbf16>, vector<8x8xbf16>, vector<8x8xf32> -> vector<8x8xf32>
    %cst_34 = arith.constant dense<0xFF800000> : vector<8xf32>
    %55 = vector.multi_reduction <maximumf>, %54, %cst_34 [1] : vector<8x8xf32> to vector<8xf32>
    %56 = vector.shape_cast %55 : vector<8xf32> to vector<8x1xf32>
    %57 = vector.broadcast %56 : vector<8x1xf32> to vector<8x8xf32>
    %58 = arith.subf %54, %57 : vector<8x8xf32>
    %59 = math.exp %58 : vector<8x8xf32>
    %cst_35 = arith.constant dense<0.000000e+00> : vector<8xf32>
    %60 = vector.multi_reduction <add>, %59, %cst_35 [1] : vector<8x8xf32> to vector<8xf32>
    %61 = vector.shape_cast %60 : vector<8xf32> to vector<8x1xf32>
    %62 = tpu.reciprocal %61 {approx = true} : vector<8x1xf32> -> vector<8x1xf32>
    %63 = vector.broadcast %62 : vector<8x1xf32> to vector<8x8xf32>
    %64 = arith.mulf %59, %63 : vector<8x8xf32>
    %65 = arith.truncf %64 : vector<8x8xf32> to vector<8x8xbf16>
    %cst_36 = arith.constant dense<0.000000e+00> : vector<8x8xf32>
    %66 = tpu.matmul %65, %53, %cst_36 {dimension_numbers = #tpu.dot_dimension_numbers<[1], [0], [0], [1], [0, 0, 1, 1], [], []>} : vector<8x8xbf16>, vector<8x8xbf16>, vector<8x8xf32> -> vector<8x8xf32>
    %67 = arith.truncf %66 : vector<8x8xf32> to vector<8x8xbf16>
    %c0_37 = arith.constant 0 : index
    %c16_38 = arith.constant 16 : index
    %68 = vector.load %arg18[%c0_37, %c16_38] : memref<8x32xbf16, #tpu.memory_space<vmem>>, vector<8x8xbf16>
    tpu.vector_store %arg18[%c0_37, %c16_38], %67 {strides = array<i32>} : memref<8x32xbf16, #tpu.memory_space<vmem>>, vector<8x8xbf16>,
    %c0_39 = arith.constant 0 : index
    %c24 = arith.constant 24 : index
    %69 = vector.load %arg17[%c0_39, %c24] : memref<8x32xbf16, #tpu.memory_space<vmem>>, vector<8x8xbf16>
    %c0_40 = arith.constant 0 : index
    %c24_41 = arith.constant 24 : index
    %70 = vector.load %arg16[%c0_40, %c24_41] : memref<8x64xbf16, #tpu.memory_space<vmem>>, vector<8x8xbf16>
    %c0_42 = arith.constant 0 : index
    %c56 = arith.constant 56 : index
    %71 = vector.load %arg16[%c0_42, %c56] : memref<8x64xbf16, #tpu.memory_space<vmem>>, vector<8x8xbf16>
    %cst_43 = arith.constant dense<0.000000e+00> : vector<8x8xf32>
    %72 = tpu.matmul %69, %70, %cst_43 {dimension_numbers = #tpu.dot_dimension_numbers<[1], [1], [0], [0], [0, 0, 1, 0], [], []>} : vector<8x8xbf16>, vector<8x8xbf16>, vector<8x8xf32> -> vector<8x8xf32>
    %cst_44 = arith.constant dense<0xFF800000> : vector<8xf32>
    %73 = vector.multi_reduction <maximumf>, %72, %cst_44 [1] : vector<8x8xf32> to vector<8xf32>
    %74 = vector.shape_cast %73 : vector<8xf32> to vector<8x1xf32>
    %75 = vector.broadcast %74 : vector<8x1xf32> to vector<8x8xf32>
    %76 = arith.subf %72, %75 : vector<8x8xf32>
    %77 = math.exp %76 : vector<8x8xf32>
    %cst_45 = arith.constant dense<0.000000e+00> : vector<8xf32>
    %78 = vector.multi_reduction <add>, %77, %cst_45 [1] : vector<8x8xf32> to vector<8xf32>
    %79 = vector.shape_cast %78 : vector<8xf32> to vector<8x1xf32>
    %80 = tpu.reciprocal %79 {approx = true} : vector<8x1xf32> -> vector<8x1xf32>
    %81 = vector.broadcast %80 : vector<8x1xf32> to vector<8x8xf32>
    %82 = arith.mulf %77, %81 : vector<8x8xf32>
    %83 = arith.truncf %82 : vector<8x8xf32> to vector<8x8xbf16>
    %cst_46 = arith.constant dense<0.000000e+00> : vector<8x8xf32>
    %84 = tpu.matmul %83, %71, %cst_46 {dimension_numbers = #tpu.dot_dimension_numbers<[1], [0], [0], [1], [0, 0, 1, 1], [], []>} : vector<8x8xbf16>, vector<8x8xbf16>, vector<8x8xf32> -> vector<8x8xf32>
    %85 = arith.truncf %84 : vector<8x8xf32> to vector<8x8xbf16>
    %c0_47 = arith.constant 0 : index
    %c24_48 = arith.constant 24 : index
    %86 = vector.load %arg18[%c0_47, %c24_48] : memref<8x32xbf16, #tpu.memory_space<vmem>>, vector<8x8xbf16>
    tpu.vector_store %arg18[%c0_47, %c24_48], %85 {strides = array<i32>} : memref<8x32xbf16, #tpu.memory_space<vmem>>, vector<8x8xbf16>,
    %c0_49 = arith.constant 0 : index
    %c0_50 = arith.constant 0 : index
    %87 = vector.load %arg18[%c0_49, %c0_50] : memref<8x32xbf16, #tpu.memory_space<vmem>>, vector<8x32xbf16>
    %c0_51 = arith.constant 0 : index
    %c0_52 = arith.constant 0 : index
    %88 = vector.load %arg7[%c0_51, %c0_52] : memref<32x32xbf16, #tpu.memory_space<vmem>>, vector<32x32xbf16>
    %cst_53 = arith.constant dense<0.000000e+00> : vector<8x32xf32>
    %89 = tpu.matmul %87, %88, %cst_53 {dimension_numbers = #tpu.dot_dimension_numbers<[1], [0], [0], [1], [0, 0, 1, 1], [], []>} : vector<8x32xbf16>, vector<32x32xbf16>, vector<8x32xf32> -> vector<8x32xf32>
    %c0_54 = arith.constant 0 : index
    %c0_55 = arith.constant 0 : index
    %90 = vector.load %arg8[%c0_54, %c0_55] : memref<1x32xf32, #tpu.memory_space<vmem>>, vector<1x32xf32>
    %91 = vector.broadcast %90 : vector<1x32xf32> to vector<8x32xf32>
    %92 = arith.addf %89, %91 : vector<8x32xf32>
    %93 = arith.truncf %92 : vector<8x32xf32> to vector<8x32xbf16>
    %c0_56 = arith.constant 0 : index
    %c0_57 = arith.constant 0 : index
    %94 = vector.load %arg9[%c0_56, %c0_57] : memref<32x64xbf16, #tpu.memory_space<vmem>>, vector<32x64xbf16>
    %cst_58 = arith.constant dense<0.000000e+00> : vector<8x64xf32>
    %95 = tpu.matmul %93, %94, %cst_58 {dimension_numbers = #tpu.dot_dimension_numbers<[1], [0], [0], [1], [0, 0, 1, 1], [], []>} : vector<8x32xbf16>, vector<32x64xbf16>, vector<8x64xf32> -> vector<8x64xf32>
    %c0_59 = arith.constant 0 : index
    %c0_60 = arith.constant 0 : index
    %96 = vector.load %arg10[%c0_59, %c0_60] : memref<1x64xf32, #tpu.memory_space<vmem>>, vector<1x64xf32>
    %97 = vector.broadcast %96 : vector<1x64xf32> to vector<8x64xf32>
    %98 = arith.addf %95, %97 : vector<8x64xf32>
    %cst_61 = arith.constant 0.000000e+00 : f32
    %99 = vector.broadcast %cst_61 : f32 to vector<8x64xf32>
    %100 = arith.maximumf %98, %99 : vector<8x64xf32>
    %101 = arith.truncf %100 : vector<8x64xf32> to vector<8x64xbf16>
    %c0_62 = arith.constant 0 : index
    %c0_63 = arith.constant 0 : index
    %102 = vector.load %arg11[%c0_62, %c0_63] : memref<64x32xbf16, #tpu.memory_space<vmem>>, vector<64x32xbf16>
    %cst_64 = arith.constant dense<0.000000e+00> : vector<8x32xf32>
    %103 = tpu.matmul %101, %102, %cst_64 {dimension_numbers = #tpu.dot_dimension_numbers<[1], [0], [0], [1], [0, 0, 1, 1], [], []>} : vector<8x64xbf16>, vector<64x32xbf16>, vector<8x32xf32> -> vector<8x32xf32>
    %c0_65 = arith.constant 0 : index
    %c0_66 = arith.constant 0 : index
    %104 = vector.load %arg12[%c0_65, %c0_66] : memref<1x32xf32, #tpu.memory_space<vmem>>, vector<1x32xf32>
    %105 = vector.broadcast %104 : vector<1x32xf32> to vector<8x32xf32>
    %106 = arith.addf %103, %105 : vector<8x32xf32>
    %107 = arith.addf %106, %92 : vector<8x32xf32>
    %cst_67 = arith.constant dense<0.000000e+00> : vector<8xf32>
    %108 = vector.multi_reduction <add>, %107, %cst_67 [1] : vector<8x32xf32> to vector<8xf32>
    %109 = vector.shape_cast %108 : vector<8xf32> to vector<8x1xf32>
    %cst_68 = arith.constant 3.200000e+01 : f32
    %110 = vector.broadcast %cst_68 : f32 to vector<8x1xf32>
    %111 = arith.divf %109, %110 : vector<8x1xf32>
    %112 = vector.broadcast %111 : vector<8x1xf32> to vector<8x32xf32>
    %113 = arith.subf %107, %112 : vector<8x32xf32>
    %114 = arith.mulf %113, %113 : vector<8x32xf32>
    %cst_69 = arith.constant dense<0.000000e+00> : vector<8xf32>
    %115 = vector.multi_reduction <add>, %114, %cst_69 [1] : vector<8x32xf32> to vector<8xf32>
    %116 = vector.shape_cast %115 : vector<8xf32> to vector<8x1xf32>
    %cst_70 = arith.constant 3.200000e+01 : f32
    %117 = vector.broadcast %cst_70 : f32 to vector<8x1xf32>
    %118 = arith.divf %116, %117 : vector<8x1xf32>
    %119 = vector.broadcast %111 : vector<8x1xf32> to vector<8x32xf32>
    %120 = arith.subf %107, %119 : vector<8x32xf32>
    %cst_71 = arith.constant 9.99999997E-7 : f32
    %121 = vector.broadcast %cst_71 : f32 to vector<8x1xf32>
    %122 = arith.addf %118, %121 : vector<8x1xf32>
    %123 = math.rsqrt %122 : vector<8x1xf32>
    %124 = vector.broadcast %123 : vector<8x1xf32> to vector<8x32xf32>
    %125 = arith.mulf %120, %124 : vector<8x32xf32>
    %c0_72 = arith.constant 0 : index
    %c0_73 = arith.constant 0 : index
    %126 = vector.load %arg13[%c0_72, %c0_73] : memref<1x32xf32, #tpu.memory_space<vmem>>, vector<1x32xf32>
    %127 = vector.broadcast %126 : vector<1x32xf32> to vector<8x32xf32>
    %128 = arith.mulf %125, %127 : vector<8x32xf32>
    %c0_74 = arith.constant 0 : index
    %c0_75 = arith.constant 0 : index
    %129 = vector.load %arg14[%c0_74, %c0_75] : memref<1x32xf32, #tpu.memory_space<vmem>>, vector<1x32xf32>
    %130 = vector.broadcast %129 : vector<1x32xf32> to vector<8x32xf32>
    %131 = arith.addf %128, %130 : vector<8x32xf32>
    %c0_76 = arith.constant 0 : index
    %c0_77 = arith.constant 0 : index
    %c0_78 = arith.constant 0 : index
    %132 = vector.load %arg15[%c0_76, %c0_77, %c0_78] : memref<1x8x32xf32, #tpu.memory_space<vmem>>, vector<1x8x32xf32>
    %133 = vector.shape_cast %132 : vector<1x8x32xf32> to vector<8x32xf32>
    %134 = vector.shape_cast %131 : vector<8x32xf32> to vector<1x8x32xf32>
    tpu.vector_store %arg15[%c0_76, %c0_77, %c0_78], %134 {strides = array<i32>} : memref<1x8x32xf32, #tpu.memory_space<vmem>>, vector<1x8x32xf32>,
    return
  }
  func.func @transform_0(%arg0: i32, %arg1: i32) -> (i32, i32, i32) {
    %c0_i32 = arith.constant 0 : i32
    %c0_i32_0 = arith.constant 0 : i32
    %c0_i32_1 = arith.constant 0 : i32
    return %arg0, %c0_i32, %c0_i32_0 : i32, i32, i32
  }
  func.func @transform_1(%arg0: i32, %arg1: i32) -> (i32, i32) {
    %c0_i32 = arith.constant 0 : i32
    %c0_i32_0 = arith.constant 0 : i32
    %c0_i32_1 = arith.constant 0 : i32
    return %c0_i32, %c0_i32_0 : i32, i32
  }
  func.func @transform_2(%arg0: i32, %arg1: i32) -> (i32, i32) {
    %c0_i32 = arith.constant 0 : i32
    %c0_i32_0 = arith.constant 0 : i32
    %c0_i32_1 = arith.constant 0 : i32
    return %c0_i32, %c0_i32_0 : i32, i32
  }
  func.func @transform_3(%arg0: i32, %arg1: i32) -> (i32, i32) {
    %c0_i32 = arith.constant 0 : i32
    %c0_i32_0 = arith.constant 0 : i32
    %c0_i32_1 = arith.constant 0 : i32
    return %c0_i32, %c0_i32_0 : i32, i32
  }
  func.func @transform_4(%arg0: i32, %arg1: i32) -> (i32, i32) {
    %c0_i32 = arith.constant 0 : i32
    %c0_i32_0 = arith.constant 0 : i32
    %c0_i32_1 = arith.constant 0 : i32
    return %c0_i32, %c0_i32_0 : i32, i32
  }
  func.func @transform_5(%arg0: i32, %arg1: i32) -> (i32, i32) {
    %c0_i32 = arith.constant 0 : i32
    %c0_i32_0 = arith.constant 0 : i32
    %c0_i32_1 = arith.constant 0 : i32
    return %c0_i32, %c0_i32_0 : i32, i32
  }
  func.func @transform_6(%arg0: i32, %arg1: i32) -> (i32, i32) {
    %c0_i32 = arith.constant 0 : i32
    %c0_i32_0 = arith.constant 0 : i32
    %c0_i32_1 = arith.constant 0 : i32
    return %c0_i32, %c0_i32_0 : i32, i32
  }
  func.func @transform_7(%arg0: i32, %arg1: i32) -> (i32, i32) {
    %c0_i32 = arith.constant 0 : i32
    %c0_i32_0 = arith.constant 0 : i32
    %c0_i32_1 = arith.constant 0 : i32
    return %c0_i32, %c0_i32_0 : i32, i32
  }
  func.func @transform_8(%arg0: i32, %arg1: i32) -> (i32, i32) {
    %c0_i32 = arith.constant 0 : i32
    %c0_i32_0 = arith.constant 0 : i32
    %c0_i32_1 = arith.constant 0 : i32
    return %c0_i32, %c0_i32_0 : i32, i32
  }
  func.func @transform_9(%arg0: i32, %arg1: i32) -> (i32, i32) {
    %c0_i32 = arith.constant 0 : i32
    %c0_i32_0 = arith.constant 0 : i32
    %c0_i32_1 = arith.constant 0 : i32
    return %c0_i32, %c0_i32_0 : i32, i32
  }
  func.func @transform_10(%arg0: i32, %arg1: i32) -> (i32, i32) {
    %c0_i32 = arith.constant 0 : i32
    %c0_i32_0 = arith.constant 0 : i32
    %c0_i32_1 = arith.constant 0 : i32
    return %c0_i32, %c0_i32_0 : i32, i32
  }
  func.func @transform_11(%arg0: i32, %arg1: i32) -> (i32, i32) {
    %c0_i32 = arith.constant 0 : i32
    %c0_i32_0 = arith.constant 0 : i32
    %c0_i32_1 = arith.constant 0 : i32
    return %c0_i32, %c0_i32_0 : i32, i32
  }
  func.func @transform_12(%arg0: i32, %arg1: i32) -> (i32, i32) {
    %c0_i32 = arith.constant 0 : i32
    %c0_i32_0 = arith.constant 0 : i32
    %c0_i32_1 = arith.constant 0 : i32
    return %c0_i32, %c0_i32_0 : i32, i32
  }
  func.func @transform_13(%arg0: i32, %arg1: i32) -> (i32, i32, i32) {
    %c0_i32 = arith.constant 0 : i32
    %c0_i32_0 = arith.constant 0 : i32
    return %arg0, %arg1, %c0_i32 : i32, i32, i32
  }
}

module attributes {stable_mosaic.version = 11 : i64} {
  func.func @encoder_layer_kernel(%arg0: i32, %arg1: i32, %arg2: memref<1x8x32xbf16, #tpu.memory_space<vmem>>, %arg3: memref<32x32xbf16, #tpu.memory_space<vmem>>, %arg4: memref<1x32xf32, #tpu.memory_space<vmem>>, %arg5: memref<32x64xbf16, #tpu.memory_space<vmem>>, %arg6: memref<1x64xf32, #tpu.memory_space<vmem>>, %arg7: memref<32x32xbf16, #tpu.memory_space<vmem>>, %arg8: memref<1x32xf32, #tpu.memory_space<vmem>>, %arg9: memref<32x64xbf16, #tpu.memory_space<vmem>>, %arg10: memref<1x64xf32, #tpu.memory_space<vmem>>, %arg11: memref<64x32xbf16, #tpu.memory_space<vmem>>, %arg12: memref<1x32xf32, #tpu.memory_space<vmem>>, %arg13: memref<1x32xf32, #tpu.memory_space<vmem>>, %arg14: memref<1x32xf32, #tpu.memory_space<vmem>>, %arg15: memref<1x8x32xf32, #tpu.memory_space<vmem>>, %arg16: memref<8x64xbf16, #tpu.memory_space<vmem>>, %arg17: memref<8x32xbf16, #tpu.memory_space<vmem>>, %arg18: memref<8x32xbf16, #tpu.memory_space<vmem>>) attributes {dimension_semantics = [#tpu.dimension_semantics<parallel>, #tpu.dimension_semantics<arbitrary>], iteration_bounds = array<i64: 2, 1>, scalar_prefetch = 0 : i64, scratch_operands = 3 : i64, tpu.core_type = #tpu.core_type<tc>, window_params = [{transform_indices = @transform_0, window_bounds = array<i64: 1, 8, 32>}, {pipeline_mode = #tpu.pipeline_mode<synchronous>, transform_indices = @transform_1, window_bounds = array<i64: 32, 32>}, {pipeline_mode = #tpu.pipeline_mode<synchronous>, transform_indices = @transform_2, window_bounds = array<i64: 1, 32>}, {pipeline_mode = #tpu.pipeline_mode<synchronous>, transform_indices = @transform_3, window_bounds = array<i64: 32, 64>}, {pipeline_mode = #tpu.pipeline_mode<synchronous>, transform_indices = @transform_4, window_bounds = array<i64: 1, 64>}, {pipeline_mode = #tpu.pipeline_mode<synchronous>, transform_indices = @transform_5, window_bounds = array<i64: 32, 32>}, {pipeline_mode = #tpu.pipeline_mode<synchronous>, transform_indices = @transform_6, window_bounds = array<i64: 1, 32>}, {pipeline_mode = #tpu.pipeline_mode<synchronous>, transform_indices = @transform_7, window_bounds = array<i64: 32, 64>}, {pipeline_mode = #tpu.pipeline_mode<synchronous>, transform_indices = @transform_8, window_bounds = array<i64: 1, 64>}, {pipeline_mode = #tpu.pipeline_mode<synchronous>, transform_indices = @transform_9, window_bounds = array<i64: 64, 32>}, {pipeline_mode = #tpu.pipeline_mode<synchronous>, transform_indices = @transform_10, window_bounds = array<i64: 1, 32>}, {pipeline_mode = #tpu.pipeline_mode<synchronous>, transform_indices = @transform_11, window_bounds = array<i64: 1, 32>}, {pipeline_mode = #tpu.pipeline_mode<synchronous>, transform_indices = @transform_12, window_bounds = array<i64: 1, 32>}, {transform_indices = @transform_13, window_bounds = array<i64: 1, 8, 32>}]} {
    %c0_i32 = arith.constant 0 : i32
    %0 = arith.cmpi eq, %arg1, %c0_i32 : i32
    %1 = arith.extui %0 : i1 to i32
    %c0_i32_0 = arith.constant 0 : i32
    %2 = arith.cmpi ne, %1, %c0_i32_0 : i32
    scf.if %2 {
      %c0_79 = arith.constant 0 : index
      %c0_80 = arith.constant 0 : index
      %c0_81 = arith.constant 0 : index
      %135 = vector.load %arg2[%c0_79, %c0_80, %c0_81] : memref<1x8x32xbf16, #tpu.memory_space<vmem>>, vector<1x8x32xbf16>
      %136 = vector.shape_cast %135 : vector<1x8x32xbf16> to vector<8x32xbf16>
      %c0_82 = arith.constant 0 : index
      %c0_83 = arith.constant 0 : index
      %137 = vector.load %arg5[%c0_82, %c0_83] : memref<32x64xbf16, #tpu.memory_space<vmem>>, vector<32x64xbf16>
      %cst_84 = arith.constant dense<0.000000e+00> : vector<8x64xf32>
      %138 = tpu.matmul %136, %137, %cst_84 {dimension_numbers = #tpu.dot_dimension_numbers<[1], [0], [0], [1], [0, 0, 1, 1], [], []>} : vector<8x32xbf16>, vector<32x64xbf16>, vector<8x64xf32> -> vector<8x64xf32>
      %c0_85 = arith.constant 0 : index
      %c0_86 = arith.constant 0 : index
      %139 = vector.load %arg6[%c0_85, %c0_86] : memref<1x64xf32, #tpu.memory_space<vmem>>, vector<1x64xf32>
      %140 = vector.broadcast %139 : vector<1x64xf32> to vector<8x64xf32>
      %141 = arith.addf %138, %140 : vector<8x64xf32>
      %142 = arith.truncf %141 : vector<8x64xf32> to vector<8x64xbf16>
      %c0_87 = arith.constant 0 : index
      %c0_88 = arith.constant 0 : index
      %143 = vector.load %arg16[%c0_87, %c0_88] : memref<8x64xbf16, #tpu.memory_space<vmem>>, vector<8x64xbf16>
      tpu.vector_store %arg16[%c0_87, %c0_88], %142 {strides = array<i32>} : memref<8x64xbf16, #tpu.memory_space<vmem>>, vector<8x64xbf16>,
    } else {
    }
    %c8_i32 = arith.constant 8 : i32
    %3 = arith.muli %arg1, %c8_i32 : i32
    %4 = tpu.assume_multiple %3, 8 : i32
    %c0 = arith.constant 0 : index
    %5 = arith.index_cast %4 : i32 to index
    %c0_1 = arith.constant 0 : index
    %6 = vector.load %arg2[%c0, %5, %c0_1] : memref<1x8x32xbf16, #tpu.memory_space<vmem>>, vector<1x8x32xbf16>
    %7 = vector.shape_cast %6 : vector<1x8x32xbf16> to vector<8x32xbf16>
    %c0_2 = arith.constant 0 : index
    %c0_3 = arith.constant 0 : index
    %8 = vector.load %arg3[%c0_2, %c0_3] : memref<32x32xbf16, #tpu.memory_space<vmem>>, vector<32x32xbf16>
    %cst = arith.constant dense<0.000000e+00> : vector<8x32xf32>
    %9 = tpu.matmul %7, %8, %cst {dimension_numbers = #tpu.dot_dimension_numbers<[1], [0], [0], [1], [0, 0, 1, 1], [], []>} : vector<8x32xbf16>, vector<32x32xbf16>, vector<8x32xf32> -> vector<8x32xf32>
    %c0_4 = arith.constant 0 : index
    %c0_5 = arith.constant 0 : index
    %10 = vector.load %arg4[%c0_4, %c0_5] : memref<1x32xf32, #tpu.memory_space<vmem>>, vector<1x32xf32>
    %11 = vector.broadcast %10 : vector<1x32xf32> to vector<8x32xf32>
    %12 = arith.addf %9, %11 : vector<8x32xf32>
    %13 = arith.truncf %12 : vector<8x32xf32> to vector<8x32xbf16>
    %c0_6 = arith.constant 0 : index
    %c0_7 = arith.constant 0 : index
    %14 = vector.load %arg17[%c0_6, %c0_7] : memref<8x32xbf16, #tpu.memory_space<vmem>>, vector<8x32xbf16>
    tpu.vector_store %arg17[%c0_6, %c0_7], %13 {strides = array<i32>} : memref<8x32xbf16, #tpu.memory_space<vmem>>, vector<8x32xbf16>,
    %c0_8 = arith.constant 0 : index
    %c0_9 = arith.constant 0 : index
    %15 = vector.load %arg17[%c0_8, %c0_9] : memref<8x32xbf16, #tpu.memory_space<vmem>>, vector<8x8xbf16>
    %c0_10 = arith.constant 0 : index
    %c0_11 = arith.constant 0 : index
    %16 = vector.load %arg16[%c0_10, %c0_11] : memref<8x64xbf16, #tpu.memory_space<vmem>>, vector<8x8xbf16>
    %c0_12 = arith.constant 0 : index
    %c32 = arith.constant 32 : index
    %17 = vector.load %arg16[%c0_12, %c32] : memref<8x64xbf16, #tpu.memory_space<vmem>>, vector<8x8xbf16>
    %cst_13 = arith.constant dense<0.000000e+00> : vector<8x8xf32>
    %18 = tpu.matmul %15, %16, %cst_13 {dimension_numbers = #tpu.dot_dimension_numbers<[1], [1], [0], [0], [0, 0, 1, 0], [], []>} : vector<8x8xbf16>, vector<8x8xbf16>, vector<8x8xf32> -> vector<8x8xf32>
    %cst_14 = arith.constant dense<0xFF800000> : vector<8xf32>
    %19 = vector.multi_reduction <maximumf>, %18, %cst_14 [1] : vector<8x8xf32> to vector<8xf32>
    %20 = vector.shape_cast %19 : vector<8xf32> to vector<8x1xf32>
    %21 = vector.broadcast %20 : vector<8x1xf32> to vector<8x8xf32>
    %22 = arith.subf %18, %21 : vector<8x8xf32>
    %23 = math.exp %22 : vector<8x8xf32>
    %cst_15 = arith.constant dense<0.000000e+00> : vector<8xf32>
    %24 = vector.multi_reduction <add>, %23, %cst_15 [1] : vector<8x8xf32> to vector<8xf32>
    %25 = vector.shape_cast %24 : vector<8xf32> to vector<8x1xf32>
    %26 = tpu.reciprocal %25 {approx = true} : vector<8x1xf32> -> vector<8x1xf32>
    %27 = vector.broadcast %26 : vector<8x1xf32> to vector<8x8xf32>
    %28 = arith.mulf %23, %27 : vector<8x8xf32>
    %29 = arith.truncf %28 : vector<8x8xf32> to vector<8x8xbf16>
    %cst_16 = arith.constant dense<0.000000e+00> : vector<8x8xf32>
    %30 = tpu.matmul %29, %17, %cst_16 {dimension_numbers = #tpu.dot_dimension_numbers<[1], [0], [0], [1], [0, 0, 1, 1], [], []>} : vector<8x8xbf16>, vector<8x8xbf16>, vector<8x8xf32> -> vector<8x8xf32>
    %31 = arith.truncf %30 : vector<8x8xf32> to vector<8x8xbf16>
    %c0_17 = arith.constant 0 : index
    %c0_18 = arith.constant 0 : index
    %32 = vector.load %arg18[%c0_17, %c0_18] : memref<8x32xbf16, #tpu.memory_space<vmem>>, vector<8x8xbf16>
    tpu.vector_store %arg18[%c0_17, %c0_18], %31 {strides = array<i32>} : memref<8x32xbf16, #tpu.memory_space<vmem>>, vector<8x8xbf16>,
    %c0_19 = arith.constant 0 : index
    %c8 = arith.constant 8 : index
    %33 = vector.load %arg17[%c0_19, %c8] : memref<8x32xbf16, #tpu.memory_space<vmem>>, vector<8x8xbf16>
    %c0_20 = arith.constant 0 : index
    %c8_21 = arith.constant 8 : index
    %34 = vector.load %arg16[%c0_20, %c8_21] : memref<8x64xbf16, #tpu.memory_space<vmem>>, vector<8x8xbf16>
    %c0_22 = arith.constant 0 : index
    %c40 = arith.constant 40 : index
    %35 = vector.load %arg16[%c0_22, %c40] : memref<8x64xbf16, #tpu.memory_space<vmem>>, vector<8x8xbf16>
    %cst_23 = arith.constant dense<0.000000e+00> : vector<8x8xf32>
    %36 = tpu.matmul %33, %34, %cst_23 {dimension_numbers = #tpu.dot_dimension_numbers<[1], [1], [0], [0], [0, 0, 1, 0], [], []>} : vector<8x8xbf16>, vector<8x8xbf16>, vector<8x8xf32> -> vector<8x8xf32>
    %cst_24 = arith.constant dense<0xFF800000> : vector<8xf32>
    %37 = vector.multi_reduction <maximumf>, %36, %cst_24 [1] : vector<8x8xf32> to vector<8xf32>
    %38 = vector.shape_cast %37 : vector<8xf32> to vector<8x1xf32>
    %39 = vector.broadcast %38 : vector<8x1xf32> to vector<8x8xf32>
    %40 = arith.subf %36, %39 : vector<8x8xf32>
    %41 = math.exp %40 : vector<8x8xf32>
    %cst_25 = arith.constant dense<0.000000e+00> : vector<8xf32>
    %42 = vector.multi_reduction <add>, %41, %cst_25 [1] : vector<8x8xf32> to vector<8xf32>
    %43 = vector.shape_cast %42 : vector<8xf32> to vector<8x1xf32>
    %44 = tpu.reciprocal %43 {approx = true} : vector<8x1xf32> -> vector<8x1xf32>
    %45 = vector.broadcast %44 : vector<8x1xf32> to vector<8x8xf32>
    %46 = arith.mulf %41, %45 : vector<8x8xf32>
    %47 = arith.truncf %46 : vector<8x8xf32> to vector<8x8xbf16>
    %cst_26 = arith.constant dense<0.000000e+00> : vector<8x8xf32>
    %48 = tpu.matmul %47, %35, %cst_26 {dimension_numbers = #tpu.dot_dimension_numbers<[1], [0], [0], [1], [0, 0, 1, 1], [], []>} : vector<8x8xbf16>, vector<8x8xbf16>, vector<8x8xf32> -> vector<8x8xf32>
    %49 = arith.truncf %48 : vector<8x8xf32> to vector<8x8xbf16>
    %c0_27 = arith.constant 0 : index
    %c8_28 = arith.constant 8 : index
    %50 = vector.load %arg18[%c0_27, %c8_28] : memref<8x32xbf16, #tpu.memory_space<vmem>>, vector<8x8xbf16>
    tpu.vector_store %arg18[%c0_27, %c8_28], %49 {strides = array<i32>} : memref<8x32xbf16, #tpu.memory_space<vmem>>, vector<8x8xbf16>,
    %c0_29 = arith.constant 0 : index
    %c16 = arith.constant 16 : index
    %51 = vector.load %arg17[%c0_29, %c16] : memref<8x32xbf16, #tpu.memory_space<vmem>>, vector<8x8xbf16>
    %c0_30 = arith.constant 0 : index
    %c16_31 = arith.constant 16 : index
    %52 = vector.load %arg16[%c0_30, %c16_31] : memref<8x64xbf16, #tpu.memory_space<vmem>>, vector<8x8xbf16>
    %c0_32 = arith.constant 0 : index
    %c48 = arith.constant 48 : index
    %53 = vector.load %arg16[%c0_32, %c48] : memref<8x64xbf16, #tpu.memory_space<vmem>>, vector<8x8xbf16>
    %cst_33 = arith.constant dense<0.000000e+00> : vector<8x8xf32>
    %54 = tpu.matmul %51, %52, %cst_33 {dimension_numbers = #tpu.dot_dimension_numbers<[1], [1], [0], [0], [0, 0, 1, 0], [], []>} : vector<8x8xbf16>, vector<8x8xbf16>, vector<8x8xf32> -> vector<8x8xf32>
    %cst_34 = arith.constant dense<0xFF800000> : vector<8xf32>
    %55 = vector.multi_reduction <maximumf>, %54, %cst_34 [1] : vector<8x8xf32> to vector<8xf32>
    %56 = vector.shape_cast %55 : vector<8xf32> to vector<8x1xf32>
    %57 = vector.broadcast %56 : vector<8x1xf32> to vector<8x8xf32>
    %58 = arith.subf %54, %57 : vector<8x8xf32>
    %59 = math.exp %58 : vector<8x8xf32>
    %cst_35 = arith.constant dense<0.000000e+00> : vector<8xf32>
    %60 = vector.multi_reduction <add>, %59, %cst_35 [1] : vector<8x8xf32> to vector<8xf32>
    %61 = vector.shape_cast %60 : vector<8xf32> to vector<8x1xf32>
    %62 = tpu.reciprocal %61 {approx = true} : vector<8x1xf32> -> vector<8x1xf32>
    %63 = vector.broadcast %62 : vector<8x1xf32> to vector<8x8xf32>
    %64 = arith.mulf %59, %63 : vector<8x8xf32>
    %65 = arith.truncf %64 : vector<8x8xf32> to vector<8x8xbf16>
    %cst_36 = arith.constant dense<0.000000e+00> : vector<8x8xf32>
    %66 = tpu.matmul %65, %53, %cst_36 {dimension_numbers = #tpu.dot_dimension_numbers<[1], [0], [0], [1], [0, 0, 1, 1], [], []>} : vector<8x8xbf16>, vector<8x8xbf16>, vector<8x8xf32> -> vector<8x8xf32>
    %67 = arith.truncf %66 : vector<8x8xf32> to vector<8x8xbf16>
    %c0_37 = arith.constant 0 : index
    %c16_38 = arith.constant 16 : index
    %68 = vector.load %arg18[%c0_37, %c16_38] : memref<8x32xbf16, #tpu.memory_space<vmem>>, vector<8x8xbf16>
    tpu.vector_store %arg18[%c0_37, %c16_38], %67 {strides = array<i32>} : memref<8x32xbf16, #tpu.memory_space<vmem>>, vector<8x8xbf16>,
    %c0_39 = arith.constant 0 : index
    %c24 = arith.constant 24 : index
    %69 = vector.load %arg17[%c0_39, %c24] : memref<8x32xbf16, #tpu.memory_space<vmem>>, vector<8x8xbf16>
    %c0_40 = arith.constant 0 : index
    %c24_41 = arith.constant 24 : index
    %70 = vector.load %arg16[%c0_40, %c24_41] : memref<8x64xbf16, #tpu.memory_space<vmem>>, vector<8x8xbf16>
    %c0_42 = arith.constant 0 : index
    %c56 = arith.constant 56 : index
    %71 = vector.load %arg16[%c0_42, %c56] : memref<8x64xbf16, #tpu.memory_space<vmem>>, vector<8x8xbf16>
    %cst_43 = arith.constant dense<0.000000e+00> : vector<8x8xf32>
    %72 = tpu.matmul %69, %70, %cst_43 {dimension_numbers = #tpu.dot_dimension_numbers<[1], [1], [0], [0], [0, 0, 1, 0], [], []>} : vector<8x8xbf16>, vector<8x8xbf16>, vector<8x8xf32> -> vector<8x8xf32>
    %cst_44 = arith.constant dense<0xFF800000> : vector<8xf32>
    %73 = vector.multi_reduction <maximumf>, %72, %cst_44 [1] : vector<8x8xf32> to vector<8xf32>
    %74 = vector.shape_cast %73 : vector<8xf32> to vector<8x1xf32>
    %75 = vector.broadcast %74 : vector<8x1xf32> to vector<8x8xf32>
    %76 = arith.subf %72, %75 : vector<8x8xf32>
    %77 = math.exp %76 : vector<8x8xf32>
    %cst_45 = arith.constant dense<0.000000e+00> : vector<8xf32>
    %78 = vector.multi_reduction <add>, %77, %cst_45 [1] : vector<8x8xf32> to vector<8xf32>
    %79 = vector.shape_cast %78 : vector<8xf32> to vector<8x1xf32>
    %80 = tpu.reciprocal %79 {approx = true} : vector<8x1xf32> -> vector<8x1xf32>
    %81 = vector.broadcast %80 : vector<8x1xf32> to vector<8x8xf32>
    %82 = arith.mulf %77, %81 : vector<8x8xf32>
    %83 = arith.truncf %82 : vector<8x8xf32> to vector<8x8xbf16>
    %cst_46 = arith.constant dense<0.000000e+00> : vector<8x8xf32>
    %84 = tpu.matmul %83, %71, %cst_46 {dimension_numbers = #tpu.dot_dimension_numbers<[1], [0], [0], [1], [0, 0, 1, 1], [], []>} : vector<8x8xbf16>, vector<8x8xbf16>, vector<8x8xf32> -> vector<8x8xf32>
    %85 = arith.truncf %84 : vector<8x8xf32> to vector<8x8xbf16>
    %c0_47 = arith.constant 0 : index
    %c24_48 = arith.constant 24 : index
    %86 = vector.load %arg18[%c0_47, %c24_48] : memref<8x32xbf16, #tpu.memory_space<vmem>>, vector<8x8xbf16>
    tpu.vector_store %arg18[%c0_47, %c24_48], %85 {strides = array<i32>} : memref<8x32xbf16, #tpu.memory_space<vmem>>, vector<8x8xbf16>,
    %c0_49 = arith.constant 0 : index
    %c0_50 = arith.constant 0 : index
    %87 = vector.load %arg18[%c0_49, %c0_50] : memref<8x32xbf16, #tpu.memory_space<vmem>>, vector<8x32xbf16>
    %c0_51 = arith.constant 0 : index
    %c0_52 = arith.constant 0 : index
    %88 = vector.load %arg7[%c0_51, %c0_52] : memref<32x32xbf16, #tpu.memory_space<vmem>>, vector<32x32xbf16>
    %cst_53 = arith.constant dense<0.000000e+00> : vector<8x32xf32>
    %89 = tpu.matmul %87, %88, %cst_53 {dimension_numbers = #tpu.dot_dimension_numbers<[1], [0], [0], [1], [0, 0, 1, 1], [], []>} : vector<8x32xbf16>, vector<32x32xbf16>, vector<8x32xf32> -> vector<8x32xf32>
    %c0_54 = arith.constant 0 : index
    %c0_55 = arith.constant 0 : index
    %90 = vector.load %arg8[%c0_54, %c0_55] : memref<1x32xf32, #tpu.memory_space<vmem>>, vector<1x32xf32>
    %91 = vector.broadcast %90 : vector<1x32xf32> to vector<8x32xf32>
    %92 = arith.addf %89, %91 : vector<8x32xf32>
    %93 = arith.truncf %92 : vector<8x32xf32> to vector<8x32xbf16>
    %c0_56 = arith.constant 0 : index
    %c0_57 = arith.constant 0 : index
    %94 = vector.load %arg9[%c0_56, %c0_57] : memref<32x64xbf16, #tpu.memory_space<vmem>>, vector<32x64xbf16>
    %cst_58 = arith.constant dense<0.000000e+00> : vector<8x64xf32>
    %95 = tpu.matmul %93, %94, %cst_58 {dimension_numbers = #tpu.dot_dimension_numbers<[1], [0], [0], [1], [0, 0, 1, 1], [], []>} : vector<8x32xbf16>, vector<32x64xbf16>, vector<8x64xf32> -> vector<8x64xf32>
    %c0_59 = arith.constant 0 : index
    %c0_60 = arith.constant 0 : index
    %96 = vector.load %arg10[%c0_59, %c0_60] : memref<1x64xf32, #tpu.memory_space<vmem>>, vector<1x64xf32>
    %97 = vector.broadcast %96 : vector<1x64xf32> to vector<8x64xf32>
    %98 = arith.addf %95, %97 : vector<8x64xf32>
    %cst_61 = arith.constant 0.000000e+00 : f32
    %99 = vector.broadcast %cst_61 : f32 to vector<8x64xf32>
    %100 = arith.maximumf %98, %99 : vector<8x64xf32>
    %101 = arith.truncf %100 : vector<8x64xf32> to vector<8x64xbf16>
    %c0_62 = arith.constant 0 : index
    %c0_63 = arith.constant 0 : index
    %102 = vector.load %arg11[%c0_62, %c0_63] : memref<64x32xbf16, #tpu.memory_space<vmem>>, vector<64x32xbf16>
    %cst_64 = arith.constant dense<0.000000e+00> : vector<8x32xf32>
    %103 = tpu.matmul %101, %102, %cst_64 {dimension_numbers = #tpu.dot_dimension_numbers<[1], [0], [0], [1], [0, 0, 1, 1], [], []>} : vector<8x64xbf16>, vector<64x32xbf16>, vector<8x32xf32> -> vector<8x32xf32>
    %c0_65 = arith.constant 0 : index
    %c0_66 = arith.constant 0 : index
    %104 = vector.load %arg12[%c0_65, %c0_66] : memref<1x32xf32, #tpu.memory_space<vmem>>, vector<1x32xf32>
    %105 = vector.broadcast %104 : vector<1x32xf32> to vector<8x32xf32>
    %106 = arith.addf %103, %105 : vector<8x32xf32>
    %107 = arith.addf %106, %92 : vector<8x32xf32>
    %cst_67 = arith.constant dense<0.000000e+00> : vector<8xf32>
    %108 = vector.multi_reduction <add>, %107, %cst_67 [1] : vector<8x32xf32> to vector<8xf32>
    %109 = vector.shape_cast %108 : vector<8xf32> to vector<8x1xf32>
    %cst_68 = arith.constant 3.200000e+01 : f32
    %110 = vector.broadcast %cst_68 : f32 to vector<8x1xf32>
    %111 = arith.divf %109, %110 : vector<8x1xf32>
    %112 = vector.broadcast %111 : vector<8x1xf32> to vector<8x32xf32>
    %113 = arith.subf %107, %112 : vector<8x32xf32>
    %114 = arith.mulf %113, %113 : vector<8x32xf32>
    %cst_69 = arith.constant dense<0.000000e+00> : vector<8xf32>
    %115 = vector.multi_reduction <add>, %114, %cst_69 [1] : vector<8x32xf32> to vector<8xf32>
    %116 = vector.shape_cast %115 : vector<8xf32> to vector<8x1xf32>
    %cst_70 = arith.constant 3.200000e+01 : f32
    %117 = vector.broadcast %cst_70 : f32 to vector<8x1xf32>
    %118 = arith.divf %116, %117 : vector<8x1xf32>
    %119 = vector.broadcast %111 : vector<8x1xf32> to vector<8x32xf32>
    %120 = arith.subf %107, %119 : vector<8x32xf32>
    %cst_71 = arith.constant 9.99999997E-7 : f32
    %121 = vector.broadcast %cst_71 : f32 to vector<8x1xf32>
    %122 = arith.addf %118, %121 : vector<8x1xf32>
    %123 = math.rsqrt %122 : vector<8x1xf32>
    %124 = vector.broadcast %123 : vector<8x1xf32> to vector<8x32xf32>
    %125 = arith.mulf %120, %124 : vector<8x32xf32>
    %c0_72 = arith.constant 0 : index
    %c0_73 = arith.constant 0 : index
    %126 = vector.load %arg13[%c0_72, %c0_73] : memref<1x32xf32, #tpu.memory_space<vmem>>, vector<1x32xf32>
    %127 = vector.broadcast %126 : vector<1x32xf32> to vector<8x32xf32>
    %128 = arith.mulf %125, %127 : vector<8x32xf32>
    %c0_74 = arith.constant 0 : index
    %c0_75 = arith.constant 0 : index
    %129 = vector.load %arg14[%c0_74, %c0_75] : memref<1x32xf32, #tpu.memory_space<vmem>>, vector<1x32xf32>
    %130 = vector.broadcast %129 : vector<1x32xf32> to vector<8x32xf32>
    %131 = arith.addf %128, %130 : vector<8x32xf32>
    %c0_76 = arith.constant 0 : index
    %c0_77 = arith.constant 0 : index
    %c0_78 = arith.constant 0 : index
    %132 = vector.load %arg15[%c0_76, %c0_77, %c0_78] : memref<1x8x32xf32, #tpu.memory_space<vmem>>, vector<1x8x32xf32>
    %133 = vector.shape_cast %132 : vector<1x8x32xf32> to vector<8x32xf32>
    %134 = vector.shape_cast %131 : vector<8x32xf32> to vector<1x8x32xf32>
    tpu.vector_store %arg15[%c0_76, %c0_77, %c0_78], %134 {strides = array<i32>} : memref<1x8x32xf32, #tpu.memory_space<vmem>>, vector<1x8x32xf32>,
    return
  }
  func.func @transform_0(%arg0: i32, %arg1: i32) -> (i32, i32, i32) {
    %c0_i32 = arith.constant 0 : i32
    %c0_i32_0 = arith.constant 0 : i32
    %c0_i32_1 = arith.constant 0 : i32
    return %arg0, %c0_i32, %c0_i32_0 : i32, i32, i32
  }
  func.func @transform_1(%arg0: i32, %arg1: i32) -> (i32, i32) {
    %c0_i32 = arith.constant 0 : i32
    %c0_i32_0 = arith.constant 0 : i32
    %c0_i32_1 = arith.constant 0 : i32
    return %c0_i32, %c0_i32_0 : i32, i32
  }
  func.func @transform_2(%arg0: i32, %arg1: i32) -> (i32, i32) {
    %c0_i32 = arith.constant 0 : i32
    %c0_i32_0 = arith.constant 0 : i32
    %c0_i32_1 = arith.constant 0 : i32
    return %c0_i32, %c0_i32_0 : i32, i32
  }
  func.func @transform_3(%arg0: i32, %arg1: i32) -> (i32, i32) {
    %c0_i32 = arith.constant 0 : i32
    %c0_i32_0 = arith.constant 0 : i32
    %c0_i32_1 = arith.constant 0 : i32
    return %c0_i32, %c0_i32_0 : i32, i32
  }
  func.func @transform_4(%arg0: i32, %arg1: i32) -> (i32, i32) {
    %c0_i32 = arith.constant 0 : i32
    %c0_i32_0 = arith.constant 0 : i32
    %c0_i32_1 = arith.constant 0 : i32
    return %c0_i32, %c0_i32_0 : i32, i32
  }
  func.func @transform_5(%arg0: i32, %arg1: i32) -> (i32, i32) {
    %c0_i32 = arith.constant 0 : i32
    %c0_i32_0 = arith.constant 0 : i32
    %c0_i32_1 = arith.constant 0 : i32
    return %c0_i32, %c0_i32_0 : i32, i32
  }
  func.func @transform_6(%arg0: i32, %arg1: i32) -> (i32, i32) {
    %c0_i32 = arith.constant 0 : i32
    %c0_i32_0 = arith.constant 0 : i32
    %c0_i32_1 = arith.constant 0 : i32
    return %c0_i32, %c0_i32_0 : i32, i32
  }
  func.func @transform_7(%arg0: i32, %arg1: i32) -> (i32, i32) {
    %c0_i32 = arith.constant 0 : i32
    %c0_i32_0 = arith.constant 0 : i32
    %c0_i32_1 = arith.constant 0 : i32
    return %c0_i32, %c0_i32_0 : i32, i32
  }
  func.func @transform_8(%arg0: i32, %arg1: i32) -> (i32, i32) {
    %c0_i32 = arith.constant 0 : i32
    %c0_i32_0 = arith.constant 0 : i32
    %c0_i32_1 = arith.constant 0 : i32
    return %c0_i32, %c0_i32_0 : i32, i32
  }
  func.func @transform_9(%arg0: i32, %arg1: i32) -> (i32, i32) {
    %c0_i32 = arith.constant 0 : i32
    %c0_i32_0 = arith.constant 0 : i32
    %c0_i32_1 = arith.constant 0 : i32
    return %c0_i32, %c0_i32_0 : i32, i32
  }
  func.func @transform_10(%arg0: i32, %arg1: i32) -> (i32, i32) {
    %c0_i32 = arith.constant 0 : i32
    %c0_i32_0 = arith.constant 0 : i32
    %c0_i32_1 = arith.constant 0 : i32
    return %c0_i32, %c0_i32_0 : i32, i32
  }
  func.func @transform_11(%arg0: i32, %arg1: i32) -> (i32, i32) {
    %c0_i32 = arith.constant 0 : i32
    %c0_i32_0 = arith.constant 0 : i32
    %c0_i32_1 = arith.constant 0 : i32
    return %c0_i32, %c0_i32_0 : i32, i32
  }
  func.func @transform_12(%arg0: i32, %arg1: i32) -> (i32, i32) {
    %c0_i32 = arith.constant 0 : i32
    %c0_i32_0 = arith.constant 0 : i32
    %c0_i32_1 = arith.constant 0 : i32
    return %c0_i32, %c0_i32_0 : i32, i32
  }
  func.func @transform_13(%arg0: i32, %arg1: i32) -> (i32, i32, i32) {
    %c0_i32 = arith.constant 0 : i32
    %c0_i32_0 = arith.constant 0 : i32
    return %arg0, %arg1, %c0_i32 : i32, i32, i32
  }
}

</mosaic_0001>

<bundles_post_ra>
// kernel: tpu_custom_call.1
= control target key start
LH: loop header
LB: loop body
LE: loop exit
PB: predicated region body
PF: predicated region fallthrough
CT: control target
= control target key end

     0   :  { %s2349_s0 = inlined_call_operand.hbm [shape: bf16[2,8,32], index: 0, kind: input, shape index: {}]   ;;  %s2350_s1 = inlined_call_operand.vmem [shape: bf16[32,32], index: 1, kind: input, shape index: {}]   ;;  %s2351_s2 = inlined_call_operand.vmem [shape: f32[1,32], index: 2, kind: input, shape index: {}]   ;;  %s2352_s3 = inlined_call_operand.vmem [shape: bf16[32,64], index: 3, kind: input, shape index: {}]   ;;  %s2353_s4 = inlined_call_operand.vmem [shape: f32[1,64], index: 4, kind: input, shape index: {}]   ;;  %s2354_s5 = inlined_call_operand.vmem [shape: bf16[32,32], index: 5, kind: input, shape index: {}]   ;;  %s2355_s6 = inlined_call_operand.vmem [shape: f32[1,32], index: 6, kind: input, shape index: {}]   ;;  %s2356_s7 = inlined_call_operand.hbm [shape: bf16[32,64], index: 7, kind: input, shape index: {}]   ;;  %s2357_s8 = inlined_call_operand.vmem [shape: f32[1,64], index: 8, kind: input, shape index: {}]   ;;  %s2358_s9 = inlined_call_operand.vmem [shape: bf16[64,32], index: 9, kind: input, shape index: {}]   ;;  %s2359_s10 = inlined_call_operand.vmem [shape: f32[1,32], index: 10, kind: input, shape index: {}]   ;;  %s2360_s11 = inlined_call_operand.vmem [shape: f32[1,32], index: 11, kind: input, shape index: {}]   ;;  %s2361_s12 = inlined_call_operand.vmem [shape: f32[1,32], index: 12, kind: input, shape index: {}]   ;;  %s2362_s13 = inlined_call_operand.hbm [shape: f32[2,8,32], index: 13, kind: output, shape index: {}]  }
   0x1   :  { %2378 = sst [smem:[#allocation21_spill]] %s2362_s13 }
   0x2   :  { %18 = vsyncpa [#allocation6], 0 }
   0x3   :  { %19 = vsyncpa [#allocation9], 0 }
   0x4   :  { %20 = vsyncpa [#allocation7], 0 }
   0x5   :  { %22 = vsyncpa [#allocation7 + $0x1], 0  ;;  %s2003_s25 = smov 0   ;;  %s2005_s26 = smov 0  }
   0x6   :  { %s2007_s27 = smov 0   ;;  %s2009_s28 = smov 0  }
   0x7   :  { %s2011_s29 = smov 0   ;;  %s2013_s30 = smov 0  }
   0x8 LB: > { %2379 = sst [smem:[#allocation14_spill]] %s1894_s25  ;;  %s1465_s14 = sadd.s32 4294967295, %s1914_s30   ;;  %s1914_s30 = sphi %s2013_s30, %s28_s30   ;;  %s1910_s29 = sphi %s2011_s29, %s2406_s29   ;;  %s1906_s28 = sphi %s2009_s28, %s2405_s28   ;;  %s1902_s27 = sphi %s2007_s27, %s2404_s27   ;;  %s1898_s26 = sphi %s2005_s26, %s2408_s26   ;;  %s1894_s25 = sphi %s2003_s25, %s2407_s25  }
   0x9   : > { %2380 = sst [smem:[#allocation15_spill]] %s1902_s27  ;;  %s1466_s15 = sadd.s32 4294967294, %s1914_s30  }
   0xa   : > { %2381 = sst [smem:[#allocation16_spill]] %s1910_s29  ;;  %s40_s16 = sadd.s32 1, %s1910_s29 }
   0xb   : > { %2382 = sst [smem:[#allocation17_spill]] %s1914_s30  ;;  %p42_p0 = scmp.ge.s32.totalorder %s40_s16, 2 }
   0xc   : > { %s47_s17 = sadd.s32 1, %s1902_s27  ;;  %p60_p1 = scmp.ne.s32.totalorder %s1898_s26, %s1894_s25 }
   0xd   : > { %p337_p2 = scmp.ne.s32.totalorder %s1902_s27, %s1898_s26  ;;  %s2410_s16 = smov (%p42_p0, %s40_s16), 0 }
   0xe   : > { %2383 = sst [smem:[#allocation18_spill]] %s2410_s16  ;;  %p2043_p3 = scmp.eq.s32.totalorder %s1465_s14, 0 }
   0xf   : > { %p338_p4 = scmp.eq.s32.totalorder %s1465_s14, 1  ;;  %s44_s19 = ssub.s32 %s1910_s29, %s2410_s16 }
  0x10   : > { %s2384_s18 = scalar_select %p2043_p3, 1, 0 }
  0x11   : > { %p344_p5 = scmp.eq.s32.totalorder %s1466_s15, 1  ;;  %p45_p6 = scmp.eq.s32.totalorder %s44_s19, 0 }
  0x12   : > { %p2049_p7 = por %p338_p4, %p337_p2  ;;  %p1467_p9 = scmp.ge.s32.totalorder %s1914_s30, 1 }
  0x13   : > { %p2056_p8 = por %p344_p5, %p60_p1  ;;  %p351_p10 = scmp.lt.s32.totalorder %s1914_s30, 3 }
  0x14   : > { %s2385_s20 = scalar_select %p2049_p7, 1, 0 }
  0x15   : > { %s2386_s21 = scalar_select %p2056_p8, 1, 0 }
  0x16   : > { %s2062_s22 = scalar_select %p45_p6, %s1902_s27, %s47_s17  }
  0x17   : > { %2387 = sst [smem:[#allocation19_spill]] %s2386_s21  ;;  %s1468_s23 = sshll.u32 %s1906_s28, 6 }
  0x18   : > { %2388 = sst [smem:[#allocation20_spill]] %s2062_s22  ;;  %p2071_p11 = por %p2043_p3, %p60_p1 }
  0x19   : > { %p2075_p12 = pnand %p1467_p9, %p351_p10  ;;  %s1916_s15 = smov [#allocation5]  }
  0x1a   : > { %s2389_s24 = scalar_select %p2071_p11, 1, 0 }
  0x1b   : > { %s2390_s14 = scalar_select %p2075_p12, 1, 0 }
  0x1c   : > { %s366_s19 = sshll.u32 %s1916_s15, 4  ;;  %s2082_s17 = scalar_lea.hbm %s2349_s0, %s1468_s23  ;;  %s367_s19 = int_to_ptr.vmem [resolvable:$true] %s366_s19 }
  0x1d   : > { %p1655_p13 = pneg %p2075_p12  ;;  %s1917_s22 = smov [#allocation8]  }
  0x1e   : > { %s394_s27 = sshll.u32 %s1917_s22, 4  ;;  %s1770_s16 = scalar_lea.hbm %s2082_s17, 64  ;;  %s2092_s27 = int_to_ptr.vmem [resolvable:$true] %s394_s27 }
  0x1f   : > { %p2088_p0 = pnand %p1655_p13, %p2071_p11  ;;  %p2096_p1 = pnand %p1655_p13, %p2043_p3 }
  0x20   : > { %p1771_p2 = scmp.ne.s32.totalorder %s2082_s17, %s1770_s16  ;;  %s1775_s15 = scalar_lea.hbm %s2349_s0, 128 }
  0x21   : > { %s2392_s29 = scalar_select %p2096_p1, 1, 0 }
  0x22   : > { %p1772_p4 = pneg %p2088_p0  ;;  %p1776_p9 = scmp.lt.u32.totalorder %s2082_s17, %s2349_s0 }
  0x23   : > { %p1777_p10 = scmp.lt.u32.totalorder %s1775_s15, %s1770_s16  ;;  %p1779_p8 = scmp.lt.u32.totalorder %s1770_s16, %s2082_s17 }
  0x24   : > { %p1773_p5 = pnand %p1772_p4, %p1771_p2 }
  0x25   : > { %p1778_p13 = por %p1777_p10, %p1776_p9 }
  0x26   : > { %p1774_p6 = pneg %p1773_p5 }
  0x27   : > { %p1780_p7 = por %p1779_p8, %p1778_p13 }
  0x29   : > { %p1781_p3 = pnand %p1780_p7, %p1774_p6 }
  0x2b   : > { %1784 = shalt.err (!%p1781_p3)
}
  0x2c   : > { %s1785_s13 = scalar_lea.vmem %s367_s19, 64  ;;  %p1793_p12 = scmp.lt.s32.totalorder %s367_s19, %s367_s19 }
  0x2d   : > { %p1786_p11 = scmp.ne.s32.totalorder %s367_s19, %s1785_s13  ;;  %p1794_p1 = scmp.lt.s32.totalorder %s1785_s13, %s1785_s13 }
  0x2f   : > { %p1788_p2 = pnand %p1786_p11, %p1772_p4  ;;  %p1795_p9 = por %p1794_p1, %p1793_p12 }
  0x31   : > { %p1789_p5 = pneg %p1788_p2 }
  0x33   : > { %p1796_p10 = pnand %p1795_p9, %p1789_p5 }
  0x35   : > { %1799 = shalt.err (!%p1796_p10)
}
  0x36   : > { %1658 = dma.hbm_to_vmem [thread:$0]  (!%p2088_p0), %s2082_s17, 64, %s367_s19, [#allocation6]  }
  0x37   : > { %s1800_s16 = scalar_lea.hbm %s2356_s7, 256  ;;  %p2393_p7 = scmp.ne.s32.totalorder %s2392_s29, 0 }
  0x38   : > { %p1801_p3 = scmp.ne.s32.totalorder %s2356_s7, %s1800_s16  ;;  %p1807_p12 = scmp.lt.u32.totalorder %s1800_s16, %s2356_s7 }
  0x39   : > { %p1802_p8 = pneg %p2393_p7 }
  0x3b   : > { %p1803_p11 = pnand %p1802_p8, %p1801_p3 }
  0x3d   : > { %p1804_p4 = pneg %p1803_p11 }
  0x3f   : > { %p1809_p1 = pnand %p1807_p12, %p1804_p4 }
  0x41   : > { %1812 = shalt.err (!%p1809_p1)
}
  0x42   : > { %s1813_s21 = scalar_lea.vmem %s2092_s27, 256  ;;  %p1821_p2 = scmp.lt.s32.totalorder %s2092_s27, %s2092_s27 }
  0x43   : > { %p1814_p0 = scmp.ne.s32.totalorder %s2092_s27, %s1813_s21  ;;  %p1822_p5 = scmp.lt.s32.totalorder %s1813_s21, %s1813_s21 }
  0x45   : > { %p1816_p6 = pnand %p1814_p0, %p1802_p8  ;;  %p1823_p9 = por %p1822_p5, %p1821_p2 }
  0x47   : > { %p1817_p13 = pneg %p1816_p6 }
  0x49   : > { %p1824_p10 = pnand %p1823_p9, %p1817_p13 }
  0x4b   : > { %1827 = shalt.err (!%p1824_p10)
}
  0x4c   : > { %s1918_s19 = smov 64   ;;  %s1919_s17 = smov 4  }
  0x4d   : > { %1661 = dma.hbm_to_vmem [thread:$0]  (!%p2393_p7), %s2356_s7, 256, %s2092_s27, [#allocation9], %s1918_s19, %s1918_s19, %s1919_s17  }
  0x4e   : > { %p2394_p3 = scmp.ne.s32.totalorder %s2390_s14, 0 }
  0x4f   : > { %p2395_p8 = scmp.ne.s32.totalorder (!%p2394_p3), %s2389_s24, 0 }
  0x50   : > { %425 = sbr.rel (%p2394_p3) target bundleno = 2317 (0x90d), region = 72 }
  0x57   : > { %1881 = dma.done.wait (%p2395_p8), [#allocation6], 64  }
  0x58   : > { %1883 = vsyncadd (%p2395_p8), [#allocation6], 4294967232  ;;  %p2396_p11 = scmp.ne.s32.totalorder %s2384_s18, 0 }
  0x5a   : > { %1885 = dma.done.wait (%p2396_p11), [#allocation9], 256  }
  0x5b   : > { %1887 = vsyncadd (%p2396_p11), [#allocation9], 4294967040  ;;  %v1920_v0 = vmov 0.0   ;;  %vm1921_vm0 = vmmov 0   ;;  %v1733_v1 = vld [vmem:[%s2352_s3] sm:$0xff]   ;;  %v1734_v2 = vld [vmem:[%s2352_s3 + $0x8] sm:$0xff]  }
  0x5c   : > { %1555 = vmatprep.subr.bf16.mxu1 %v1920_v0  ;;  %1559 = vmatprep.mubr.msk.bf16.mxu1 %vm1921_vm0, %v1920_v0  ;;  %v473_v3 = vld [vmem:[#allocation5] sm:$0xf]  ;;  %vm497_vm1 = vcmask 261120   ;;  %v1735_v4 = vld [vmem:[%s2350_s1] sm:$0xff]   ;;  %vm542_vm2 = vcmask 519168   ;;  %vm618_vm3 = vcmask 257024  }
  0x5d   : > { %1571 = vmatprep.subr.bf16.mxu0 %v1920_v0  ;;  %1573 = vmatprep.mubr.msk.bf16.mxu0 %vm1921_vm0, %v1920_v0  ;;  %v1736_v5 = vld [vmem:[%s2350_s1 + $0x8] sm:$0xff]   ;;  %v1473_v7 = vld [vmem:[%s2353_s4] ss:$0 sm:$0xff]  ;;  %vm622_vm4 = vcmask 64512   ;;  %s1922_s17 = smov 112   ;;  %s1923_s25 = smov 120  }
  0x5e   : > { %1556 = vmatpush3.bf16.msra.mxu1 %v1733_v1  ;;  %v549_v6 = vld [vmem:[#allocation5] sm:$0xf]  ;;  %v1477_v14 = vld [vmem:[%s2351_s2] ss:$0 sm:$0xff]  ;;  %s1924_s30 = smov 104   ;;  %s1925_s27 = smov 96  }
  0x5f   : > { %1557 = vmatprep.subr.bf16.mxu1 %v1920_v0  ;;  %s1926_s24 = smov 80   ;;  %vm689_vm5 = vcmask 1043456   ;;  %s1927_s14 = smov 72   ;;  %vm734_vm6 = vcmask 60416   ;;  %vm861_vm7 = vcmask 126016   ;;  %vm988_vm8 = vcmask 191616  }
  0x60   : > { %s1928_s18 = smov 88   ;;  %s1929_s29 = smov 8   ;;  %vm1115_vm9 = vcmask 257216   ;;  %vm1292_vm10 = vcmask 523264  }
  0x61   : > { %s1930_s15 = smov 16   ;;  %s1931_s21 = smov 24  }
  0x62   : > { %1558 = vmatpush3.bf16.msra.mxu1 %v1734_v2  ;;  %s2397_s22 = sld [smem:[#allocation21_spill]]  ;;  %p2398_p4 = scmp.ne.s32.totalorder %s2385_s20, 0 }
  0x63   : > { %1563 = vmatprep.subr.bf16.mxu1 %v1920_v0 }
  0x65   : > { %1560 = vmatmul.mubr.msk.bf16.vlgmr.msra.gmra.mrb[0].mxu1 %vm497_vm1, %v473_v3 }
  0x66   : > { %1564 = vmatpush3.bf16.msra.mxu1 %v1735_v4  ;;  %1567 = vmatprep.mubr.msk.bf16.mxu1 %vm1921_vm0, %v1920_v0 }
  0x67   : > { %1565 = vmatprep.subr.bf16.mxu1 %v1920_v0 }
  0x6a   : > { %1566 = vmatpush3.bf16.msra.mxu1 %v1736_v5 }
  0x6b   : > { %1577 = vmatprep.subr.bf16.mxu1 %v1920_v0 }
  0x6d   : > { %1568 = vmatmul.mubr.msk.bf16.vlgmr.msra.gmra.mrb[4].mxu1 %vm497_vm1, %v549_v6 }
  0x6e   : > { %1579 = vmatprep.mubr.msk.bf16.mxu1 %vm1921_vm0, %v1920_v0 }
 0x138   : > { %v535_v8 = vpop.f32.mrb[0].mxu1 }
 0x139   : > { %v536_v9 = vadd.f32 %v1473_v7, %v535_v8  ;;  %v1561_v10 = vpop.f32.mrb[1].mxu1 }
 0x13a   : > { %v538_v11 = vpop.f32.mrb[2].mxu1 }
 0x13b   : > { %v541_v12 = vpack.c.bf16 %v536_v9, %v536_v9  ;;  %v1562_v13 = vpop.f32.mrb[3].mxu1 }
 0x13d   : > { %543 = vst.msk [vmem:[#allocation2] sm:$0xf] %vm542_vm2, %v541_v12 }
 0x140   : > { %v611_v15 = vpop.f32.mrb[4].mxu1 }
 0x141   : > { %v612_v16 = vadd.f32 %v1477_v14, %v611_v15  ;;  %v1569_v17 = vpop.f32.mrb[5].mxu1 }
 0x142   : > { %v614_v18 = vpop.f32.mrb[6].mxu1 }
 0x143   : > { %v617_v19 = vpack.c.bf16 %v612_v16, %v612_v16  ;;  %v1570_v20 = vpop.f32.mrb[7].mxu1 }
 0x144   : > { %v2186_v21 = vld [vmem:[#allocation2] sm:$0xf] }
 0x145   : > { %v2188_v22 = vld [vmem:[#allocation2] ss:$0 sps:$4 sm:$0xff]   ;;  %619 = vst.msk [vmem:[#allocation3] sm:$0xf] %vm618_vm3, %v617_v19  ;;  %v627_v23 = vsel %vm622_vm4, %v2186_v21, 0  ;;  %v1482_v1 = vcombine.low %v2186_v21, %v2186_v21 }
 0x146   : > { %v2192_v24 = vld [vmem:[#allocation2] ss:$0 sps:$4 sm:$0xff]   ;;  %1572 = vmatpush3.bf16.xpose.msra.mxu0 %v627_v23  ;;  %873 = vrot.lane.b32.xlu1 %v2188_v22, %s1922_s17 }
 0x147   : > { %746 = vrot.lane.b32.xlu0 %v2192_v24, %s1923_s25  ;;  %1583 = vmatprep.subr.bf16.mxu0 %v1920_v0  ;;  %v2200_v29 = vld [vmem:[#allocation2] ss:$0 sps:$4 sm:$0xff]  }
 0x14c   : > { %v620_v25 = vld [vmem:[#allocation3] sm:$0xf] }
 0x14d   : > { %v1740_v26 = vld [vmem:[#allocation3] ss:$0 sps:$4 sm:$0xff]   ;;  %1574 = vmatmul.mubr.msk.bf16.vlgmr.msra.gmra.mrb[0].mxu0 %vm622_vm4, %v620_v25 }
 0x14e   : > { %v1741_v27 = vld [vmem:[#allocation3] ss:$0 sps:$4 sm:$0xff]   ;;  %868 = vrot.lane.b32.xlu1 %v1740_v26, %s1922_s17  ;;  %1585 = vmatprep.mubr.msk.bf16.mxu0 %vm1921_vm0, %v1920_v0 }
 0x14f   : > { %741 = vrot.lane.b32.xlu0 %v1741_v27, %s1923_s25  ;;  %v1742_v28 = vld [vmem:[#allocation3] ss:$0 sps:$4 sm:$0xff]  }
 0x152   : > { %995 = vrot.lane.b32.xlu1 %v1742_v28, %s1924_s30 }
 0x153   : > { %1000 = vrot.lane.b32.xlu0 %v2200_v29, %s1924_s30 }
 0x1b8   : > { %v874_v32 = vpop.permute.xlu1 %873 }
 0x1b9   : > { %v747_v30 = vpop.permute.xlu0 %746  ;;  %v879_v34 = vsel %vm622_vm4, %v874_v32, 0 }
 0x1ba   : > { %v752_v31 = vsel %vm622_vm4, %v747_v30, 0 }
 0x1bb   : > { %1584 = vmatpush3.bf16.xpose.msra.mxu0 %v752_v31 }
 0x1bc   : > { %1595 = vmatprep.subr.bf16.mxu0 %v1920_v0 }
 0x1c0   : > { %v869_v36 = vpop.permute.xlu1 %868 }
 0x1c1   : > { %v742_v33 = vpop.permute.xlu0 %741 }
 0x1c2   : > { %1586 = vmatmul.mubr.msk.bf16.vlgmr.msra.gmra.mrb[4].mxu0 %vm622_vm4, %v742_v33 }
 0x1c3   : > { %1596 = vmatpush3.bf16.xpose.msra.mxu0 %v879_v34  ;;  %1597 = vmatprep.mubr.msk.bf16.mxu0 %vm1921_vm0, %v1920_v0 }
 0x1c4   : > { %1607 = vmatprep.subr.bf16.mxu0 %v1920_v0  ;;  %v996_v38 = vpop.permute.xlu1 %995 }
 0x1c5   : > { %v1001_v35 = vpop.permute.xlu0 %1000 }
 0x1c6   : > { %v1006_v37 = vsel %vm622_vm4, %v1001_v35, 0 }
 0x1ca   : > { %1598 = vmatmul.mubr.msk.bf16.vlgmr.msra.gmra.mrb[8].mxu0 %vm622_vm4, %v869_v36 }
 0x1cb   : > { %1608 = vmatpush3.bf16.xpose.msra.mxu0 %v1006_v37  ;;  %1609 = vmatprep.mubr.msk.bf16.mxu0 %vm1921_vm0, %v1920_v0 }
 0x1cc   : > { %1619 = vmatprep.subr.bf16.mxu0 %v1920_v0 }
 0x1d2   : > { %1610 = vmatmul.mubr.msk.bf16.vlgmr.msra.gmra.mrb[12].mxu0 %vm622_vm4, %v996_v38 }
 0x1d3   : > { %1623 = vmatprep.mubr.msk.bf16.mxu0 %vm1921_vm0, %v1920_v0 }
 0x220   : > { %v663_v39 = vpop.f32.mrb[0].mxu0 }
 0x221   : > { %v1575_v40 = vpop.f32.mrb[1].mxu0  ;;  %v669_v41 = vsel %vm622_vm4, %v663_v39, -inf }
 0x222   : > { %670 = vmax.xlane.f32.xlu0 %v669_v41  ;;  %v666_v42 = vpop.f32.mrb[2].mxu0 }
 0x223   : > { %v1576_v43 = vpop.f32.mrb[3].mxu0 }
 0x295   : > { %v788_v44 = vpop.f32.mrb[4].mxu0 }
 0x296   : > { %v1587_v45 = vpop.f32.mrb[5].mxu0  ;;  %v794_v46 = vsel %vm622_vm4, %v788_v44, -inf }
 0x297   : > { %795 = vmax.xlane.f32.xlu1 %v794_v46  ;;  %v791_v47 = vpop.f32.mrb[6].mxu0 }
 0x298   : > { %v1588_v48 = vpop.f32.mrb[7].mxu0 }
 0x29d   : > { %v915_v49 = vpop.f32.mrb[8].mxu0 }
 0x29e   : > { %v1599_v50 = vpop.f32.mrb[9].mxu0  ;;  %v921_v51 = vsel %vm622_vm4, %v915_v49, -inf }
 0x29f   : > { %922 = vmax.xlane.f32.xlu0 %v921_v51  ;;  %v918_v52 = vpop.f32.mrb[10].mxu0  ;;  %v1744_v51 = vld [vmem:[%s2354_s5] sm:$0xff]  }
 0x2a0   : > { %v1600_v53 = vpop.f32.mrb[11].mxu0  ;;  %1620 = vmatpush3.bf16.msra.mxu0 %v1744_v51 }
 0x2a1   : > { %v1745_v53 = vld [vmem:[%s2354_s5 + $0x8] sm:$0xff]   ;;  %1621 = vmatprep.subr.bf16.mxu0 %v1920_v0 }
 0x2a4   : > { %1622 = vmatpush3.bf16.msra.mxu0 %v1745_v53 }
 0x2a5   : > { %v1042_v54 = vpop.f32.mrb[12].mxu0  ;;  %1635 = vmatprep.subr.bf16.mxu0 %v1920_v0 }
 0x2a6   : > { %v1611_v55 = vpop.f32.mrb[13].mxu0  ;;  %v1048_v56 = vsel %vm622_vm4, %v1042_v54, -inf }
 0x2a7   : > { %1049 = vmax.xlane.f32.xlu0 %v1048_v56  ;;  %v1045_v57 = vpop.f32.mrb[14].mxu0 }
 0x2a8   : > { %v1612_v58 = vpop.f32.mrb[15].mxu0 }
 0x2a9   : > { %v1746_v58 = vld [vmem:[#allocation8] sm:$0xff]  }
 0x2af   : > { %v671_v59 = vpop.xlane.xlu0 %670 }
 0x2b0   : > { %v672_v60 = vsub.f32 %v663_v39, %v671_v59 }
 0x2b2   : > { %v673_v61 = vmul.f32 1.442695, %v672_v60 }
 0x2b4   : > { %1752 = vpow2.f32 %v673_v61 }
 0x2be   : > { %v1753_v62 = vpop.eup %1752 }
 0x2bf   : > { %v675_v63 = vsel %vm622_vm4, %v1753_v62, 0.0 }
 0x2c0   : > { %676 = vadd.xlane.f32.xlu1 %v675_v63 }
 0x2d1   : > { %684 = vrot.lane.b32.xlu1 %v1482_v1, %s1925_s27 }
 0x324   : > { %v796_v2 = vpop.xlane.xlu1 %795 }
 0x325   : > { %v797_v3 = vsub.f32 %v788_v44, %v796_v2 }
 0x327   : > { %v798_v4 = vmul.f32 1.442695, %v797_v3 }
 0x329   : > { %1754 = vpow2.f32 %v798_v4 }
 0x32c   : > { %v923_v5 = vpop.xlane.xlu0 %922 }
 0x32d   : > { %v924_v6 = vsub.f32 %v915_v49, %v923_v5  ;;  %v1747_v5 = vld [vmem:[#allocation8 + $0x8] sm:$0xff]  }
 0x32f   : > { %v925_v7 = vmul.f32 1.442695, %v924_v6  ;;  %v1748_v6 = vld [vmem:[%s2358_s9] sm:$0xff]  }
 0x331   : > { %1756 = vpow2.f32 %v925_v7  ;;  %v1749_v7 = vld [vmem:[%s2358_s9 + $0x8] sm:$0xff]  }
 0x333   : > { %v1755_v8 = vpop.eup %1754 }
 0x334   : > { %v1050_v9 = vpop.xlane.xlu0 %1049  ;;  %v800_v10 = vsel %vm622_vm4, %v1755_v8, 0.0 }
 0x335   : > { %v1051_v11 = vsub.f32 %v1042_v54, %v1050_v9  ;;  %801 = vadd.xlane.f32.xlu0 %v800_v10 }
 0x337   : > { %v1052_v12 = vmul.f32 1.442695, %v1051_v11 }
 0x339   : > { %1758 = vpow2.f32 %v1052_v12 }
 0x33b   : > { %v1757_v13 = vpop.eup %1756 }
 0x33c   : > { %v927_v14 = vsel %vm622_vm4, %v1757_v13, 0.0 }
 0x33d   : > { %928 = vadd.xlane.f32.xlu1 %v927_v14 }
 0x343   : > { %v1759_v15 = vpop.eup %1758 }
 0x344   : > { %v1054_v16 = vsel %vm622_vm4, %v1759_v15, 0.0 }
 0x345   : > { %1055 = vadd.xlane.f32.xlu0 %v1054_v16  ;;  %v1751_v16 = vld [vmem:[%s2358_s9 + $0x18] sm:$0xff]  }
 0x34d   : > { %v677_v17 = vpop.xlane.xlu1 %676 }
 0x34e   : > { %1760 = vrcp.f32 %v677_v17  ;;  %933 = vrot.lane.b32.xlu1 %v2188_v22, %s1926_s24  ;;  %v1503_v17 = vld [vmem:[%s2357_s8] ss:$0 sm:$0xff]  ;;  %s1516_s24 = sshll.u32 %s1906_s28, 7  ;;  %s1932_s28 = smov [#allocation10]  }
 0x34f   : > { %s2301_s23 = scalar_lea.hbm %s2397_s22, %s1516_s24 }
 0x351   : > { %v685_v18 = vpop.permute.xlu1 %684 }
 0x352   : > { %v691_v19 = vsel %vm689_vm5, %v685_v18, 0  ;;  %1060 = vrot.lane.b32.xlu1 %v2200_v29, %s1927_s14 }
 0x353   : > { %1578 = vmatpush3.bf16.msra.mxu1 %v691_v19 }
 0x354   : > { %1589 = vmatprep.subr.bf16.mxu1 %v1920_v0 }
 0x358   : > { %v1761_v20 = vpop.eup %1760 }
 0x359   : > { %v679_v21 = vmul.f32 %v1761_v20, %v1753_v62 }
 0x35b   : > { %806 = vrot.lane.b32.xlu0 %v2192_v24, %s1928_s18  ;;  %v680_v23 = vpack.c.bf16 %v679_v21, %v679_v21 }
 0x35d   : > { %1580 = vmatmul.mubr.msk.bf16.vlgmr.msra.gmra.mrb[8].mxu1 %vm622_vm4, %v680_v23 }
 0x35e   : > { %1591 = vmatprep.mubr.msk.bf16.mxu1 %vm1921_vm0, %v1920_v0 }
 0x3c2   : > { %v802_v22 = vpop.xlane.xlu0 %801 }
 0x3c3   : > { %1762 = vrcp.f32 %v802_v22 }
 0x3ca   : > { %v929_v25 = vpop.xlane.xlu1 %928 }
 0x3cb   : > { %1764 = vrcp.f32 %v929_v25 }
 0x3cd   : > { %v1763_v26 = vpop.eup %1762 }
 0x3ce   : > { %v804_v28 = vmul.f32 %v1763_v26, %v1755_v8  ;;  %v934_v31 = vpop.permute.xlu1 %933  ;;  %v1499_v8 = vld [vmem:[%s2355_s6] ss:$0 sm:$0xff] }
 0x3cf   : > { %v939_v33 = vsel %vm689_vm5, %v934_v31, 0 }
 0x3d0   : > { %v805_v24 = vpack.c.bf16 %v804_v28, %v804_v28 }
 0x3d2   : > { %v1056_v27 = vpop.xlane.xlu0 %1055  ;;  %v1061_v35 = vpop.permute.xlu1 %1060 }
 0x3d3   : > { %1766 = vrcp.f32 %v1056_v27  ;;  %v1066_v38 = vsel %vm689_vm5, %v1061_v35, 0 }
 0x3d5   : > { %v1765_v32 = vpop.eup %1764 }
 0x3d6   : > { %v807_v29 = vpop.permute.xlu0 %806  ;;  %v931_v34 = vmul.f32 %v1765_v32, %v1757_v13 }
 0x3d7   : > { %v812_v30 = vsel %vm689_vm5, %v807_v29, 0 }
 0x3d8   : > { %1590 = vmatpush3.bf16.msra.mxu1 %v812_v30  ;;  %v932_v36 = vpack.c.bf16 %v931_v34, %v931_v34 }
 0x3d9   : > { %1601 = vmatprep.subr.bf16.mxu1 %v1920_v0 }
 0x3db   : > { %1592 = vmatmul.mubr.msk.bf16.vlgmr.msra.gmra.mrb[12].mxu1 %vm622_vm4, %v805_v24 }
 0x3dc   : > { %1602 = vmatpush3.bf16.msra.mxu1 %v939_v33  ;;  %1603 = vmatprep.mubr.msk.bf16.mxu1 %vm1921_vm0, %v1920_v0 }
 0x3dd   : > { %1613 = vmatprep.subr.bf16.mxu1 %v1920_v0  ;;  %v1767_v37 = vpop.eup %1766 }
 0x3de   : > { %v1058_v39 = vmul.f32 %v1767_v37, %v1759_v15  ;;  %v1750_v15 = vld [vmem:[%s2358_s9 + $0x10] sm:$0xff]  }
 0x3e0   : > { %v1059_v40 = vpack.c.bf16 %v1058_v39, %v1058_v39 }
 0x3e3   : > { %1604 = vmatmul.mubr.msk.bf16.vlgmr.msra.gmra.mrb[16].mxu1 %vm622_vm4, %v932_v36 }
 0x3e4   : > { %1614 = vmatpush3.bf16.msra.mxu1 %v1066_v38  ;;  %1615 = vmatprep.mubr.msk.bf16.mxu1 %vm1921_vm0, %v1920_v0 }
 0x3e5   : > { %1627 = vmatprep.subr.bf16.mxu1 %v1920_v0 }
 0x3eb   : > { %1616 = vmatmul.mubr.msk.bf16.vlgmr.msra.gmra.mrb[20].mxu1 %vm622_vm4, %v1059_v40 }
 0x3ec   : > { %1631 = vmatprep.mubr.msk.bf16.mxu1 %vm1921_vm0, %v1920_v0  ;;  %1628 = vmatpush3.bf16.msra.mxu1 %v1746_v58 }
 0x3ed   : > { %1629 = vmatprep.subr.bf16.mxu1 %v1920_v0 }
 0x3f0   : > { %1630 = vmatpush3.bf16.msra.mxu1 %v1747_v5 }
 0x430   : > { %v727_v41 = vpop.f32.mrb[8].mxu1 }
 0x431   : > { %v733_v42 = vpack.c.bf16 %v727_v41, %v727_v41  ;;  %v1581_v43 = vpop.f32.mrb[9].mxu1  ;;  %v1513_v41 = vld [vmem:[%s2360_s11] ss:$0 sm:$0xff] }
 0x432   : > { %v730_v44 = vpop.f32.mrb[10].mxu1  ;;  %v1514_v43 = vld [vmem:[%s2361_s12] ss:$0 sm:$0xff] }
 0x433   : > { %735 = vst.msk [vmem:[#allocation4] sm:$0xf] %vm734_vm6, %v733_v42  ;;  %v1582_v45 = vpop.f32.mrb[11].mxu1 }
 0x4ae   : > { %v848_v46 = vpop.f32.mrb[12].mxu1 }
 0x4af   : > { %v1519_v47 = vpack.c.bf16 %v848_v46, %v848_v46  ;;  %v1593_v48 = vpop.f32.mrb[13].mxu1 }
 0x4b0   : > { %v851_v49 = vpop.f32.mrb[14].mxu1 }
 0x4b1   : > { %858 = vrot.lane.b32.xlu0 %v1519_v47, %s1929_s29  ;;  %v1594_v50 = vpop.f32.mrb[15].mxu1 }
 0x4b6   : > { %v975_v52 = vpop.f32.mrb[16].mxu1 }
 0x4b7   : > { %v1520_v54 = vpack.c.bf16 %v975_v52, %v975_v52  ;;  %v1605_v55 = vpop.f32.mrb[17].mxu1 }
 0x4b8   : > { %v978_v56 = vpop.f32.mrb[18].mxu1 }
 0x4b9   : > { %985 = vrot.lane.b32.xlu1 %v1520_v54, %s1930_s15  ;;  %v1606_v57 = vpop.f32.mrb[19].mxu1 }
 0x4be   : > { %v1102_v59 = vpop.f32.mrb[20].mxu1 }
 0x4bf   : > { %v1521_v60 = vpack.c.bf16 %v1102_v59, %v1102_v59  ;;  %v1617_v61 = vpop.f32.mrb[21].mxu1 }
 0x4c0   : > { %v1105_v62 = vpop.f32.mrb[22].mxu1 }
 0x4c1   : > { %1112 = vrot.lane.b32.xlu0 %v1521_v60, %s1931_s21  ;;  %v1618_v63 = vpop.f32.mrb[23].mxu1  ;;  %s465_s21 = sand.u32 1, %s1898_s26  }
 0x4c2   : > { %s1472_s19 = sshll.u32 %s465_s21, 3  ;;  %s1369_s13 = scalar_lea.sflag [#allocation7], %s465_s21 }
 0x4c3   : > { %s467_s14 = scalar_lea.vmem [#allocation10], %s1472_s19  ;;  %s1832_s19 = sshll.u32 %s1932_s28, 4  ;;  %s1833_s19 = int_to_ptr.vmem [resolvable:$false] %s1832_s19 }
 0x4c4   : > { %s1383_s18 = sshll.u32 %s467_s14, 4  ;;  %s1834_s17 = scalar_lea.vmem %s1833_s19, 256  ;;  %s2303_s18 = int_to_ptr.vmem [resolvable:$true] %s1383_s18 }
 0x4c5   : > { %s1828_s15 = scalar_lea.vmem %s2303_s18, 128  ;;  %p1835_p0 = scmp.lt.s32.totalorder %s2303_s18, %s1833_s19 }
 0x4c6   : > { %p1829_p7 = scmp.ne.s32.totalorder %s2303_s18, %s1828_s15  ;;  %p1836_p6 = scmp.lt.s32.totalorder %s1834_s17, %s1828_s15 }
 0x4c8   : > { %p1830_p12 = pnand %p1829_p7, %p2398_p4  ;;  %p1837_p13 = por %p1836_p6, %p1835_p0 }
 0x4ca   : > { %p1831_p1 = pneg %p1830_p12 }
 0x4cc   : > { %p1838_p2 = pnand %p1837_p13, %p1831_p1 }
 0x523   : > { %v859_v1 = vpop.permute.xlu0 %858 }
 0x524   : > { %862 = vst.msk [vmem:[#allocation4] sm:$0xf] %vm861_vm7, %v859_v1 }
 0x52b   : > { %v986_v2 = vpop.permute.xlu1 %985 }
 0x52c   : > { %989 = vst.msk [vmem:[#allocation4] sm:$0xf] %vm988_vm8, %v986_v2 }
 0x533   : > { %v1113_v3 = vpop.permute.xlu0 %1112 }
 0x534   : > { %1116 = vst.msk [vmem:[#allocation4] sm:$0xf] %vm1115_vm9, %v1113_v3 }
 0x53b   : > { %v1117_v4 = vld [vmem:[#allocation4] sm:$0xf] }
 0x53c   : > { %1624 = vmatmul.mubr.msk.bf16.vlgmr.msra.gmra.mrb[16].mxu0 %vm497_vm1, %v1117_v4 }
 0x53d   : > { %1643 = vmatprep.mubr.msk.bf16.mxu0 %vm1921_vm0, %v1920_v0  ;;  %1636 = vmatpush3.bf16.msra.mxu0 %v1748_v6 }
 0x53e   : > { %1637 = vmatprep.subr.bf16.mxu0 %v1920_v0 }
 0x541   : > { %1638 = vmatpush3.bf16.msra.mxu0 %v1749_v7 }
 0x542   : > { %1639 = vmatprep.subr.bf16.mxu0 %v1920_v0 }
 0x545   : > { %1640 = vmatpush3.bf16.msra.mxu0 %v1750_v15 }
 0x546   : > { %1641 = vmatprep.subr.bf16.mxu0 %v1920_v0  ;;  %v1507_v0 = vld [vmem:[%s2359_s10] ss:$0 sm:$0xff] }
 0x549   : > { %1642 = vmatpush3.bf16.msra.mxu0 %v1751_v16 }
 0x60f   : > { %v1178_v9 = vpop.f32.mrb[16].mxu0 }
 0x610   : > { %v1179_v10 = vadd.f32 %v1499_v8, %v1178_v9  ;;  %v1625_v11 = vpop.f32.mrb[17].mxu0 }
 0x611   : > { %v1181_v12 = vpop.f32.mrb[18].mxu0 }
 0x612   : > { %v1184_v13 = vpack.c.bf16 %v1179_v10, %v1179_v10  ;;  %v1626_v14 = vpop.f32.mrb[19].mxu0 }
 0x614   : > { %1632 = vmatmul.mubr.msk.bf16.vlgmr.msra.gmra.mrb[24].mxu1 %vm497_vm1, %v1184_v13 }
 0x6e7   : > { %v1245_v18 = vpop.f32.mrb[24].mxu1 }
 0x6e8   : > { %v1246_v19 = vadd.f32 %v1503_v17, %v1245_v18  ;;  %v1633_v20 = vpop.f32.mrb[25].mxu1 }
 0x6e9   : > { %v1248_v21 = vpop.f32.mrb[26].mxu1 }
 0x6ea   : > { %v1251_v23 = vmax.f32 %v1246_v19, 0.0  ;;  %v1634_v22 = vpop.f32.mrb[27].mxu1 }
 0x6ec   : > { %v1252_v25 = vpack.c.bf16 %v1251_v23, %v1251_v23 }
 0x6ee   : > { %1644 = vmatmul.mubr.msk.bf16.vlgmr.msra.gmra.mrb[20].mxu0 %vm1292_vm10, %v1252_v25 }
 0x7c1   : > { %v1330_v26 = vpop.f32.mrb[20].mxu0 }
 0x7c2   : > { %v1331_v27 = vadd.f32 %v1507_v0, %v1330_v26  ;;  %v1645_v28 = vpop.f32.mrb[21].mxu0 }
 0x7c3   : > { %v1333_v29 = vpop.f32.mrb[22].mxu0 }
 0x7c4   : > { %v1646_v30 = vpop.f32.mrb[23].mxu0  ;;  %v1336_v31 = vadd.f32 %v1331_v27, %v1179_v10 }
 0x7c6   : > { %v1337_v24 = vsel %vm497_vm1, %v1336_v31, 0.0 }
 0x7c7   : > { %1338 = vadd.xlane.f32.xlu1 %v1337_v24 }
 0x854   : > { %v1339_v32 = vpop.xlane.xlu1 %1338 }
 0x855   : > { %v1341_v33 = vmul.f32 0.03125, %v1339_v32 }
 0x857   : > { %v1342_v34 = vsub.f32 %v1336_v31, %v1341_v33 }
 0x859   : > { %v1343_v35 = vmul.f32 %v1342_v34, %v1342_v34 }
 0x85b   : > { %v1344_v36 = vsel %vm497_vm1, %v1343_v35, 0.0 }
 0x85c   : > { %1345 = vadd.xlane.f32.xlu0 %v1344_v36 }
 0x8e9   : > { %v1346_v37 = vpop.xlane.xlu0 %1345 }
 0x8ea   : > { %v1347_v38 = vmul.f32 0.03125, %v1346_v37 }
 0x8ec   : > { %v1348_v39 = vadd.f32 1e-06, %v1347_v38 }
 0x8ee   : > { %1768 = vrsqrt.f32 %v1348_v39 }
 0x8f8   : > { %v1769_v40 = vpop.eup %1768 }
 0x8f9   : > { %v1350_v42 = vmul.f32 %v1769_v40, %v1342_v34 }
 0x8fb   : > { %v1358_v44 = vmul.f32 %v1513_v41, %v1350_v42 }
 0x8fd   : > { %v1366_v45 = vadd.f32 %v1514_v43, %v1358_v44 }
 0x8ff   : > { %1367 = vst.msk [vmem:[%s467_s14] sm:$0xff] %vm497_vm1, %v1366_v45 }
 0x900   : > { %1841 = shalt.err (!%p1838_p2)
}
 0x901   : > { %s1842_s21 = scalar_lea.hbm %s2301_s23, 128  ;;  %s1846_s27 = scalar_lea.hbm %s2397_s22, 256 }
 0x902   : > { %p1843_p5 = scmp.ne.s32.totalorder %s2301_s23, %s1842_s21  ;;  %p1847_p3 = scmp.lt.u32.totalorder %s2301_s23, %s2397_s22 }
 0x903   : > { %p1848_p8 = scmp.lt.u32.totalorder %s1846_s27, %s1842_s21  ;;  %p1850_p7 = scmp.lt.u32.totalorder %s1842_s21, %s2301_s23 }
 0x904   : > { %p1844_p9 = pnand %p1843_p5, %p2398_p4 }
 0x905   : > { %p1849_p11 = por %p1848_p8, %p1847_p3 }
 0x906   : > { %p1845_p10 = pneg %p1844_p9 }
 0x907   : > { %p1851_p12 = por %p1850_p7, %p1849_p11 }
 0x909   : > { %p1852_p1 = pnand %p1851_p12, %p1845_p10 }
 0x90b   : > { %1855 = shalt.err (!%p1852_p1)
}
 0x90c   : > { %1653 = dma.vmem_to_hbm [thread:$0]  (%p2398_p4), %s2303_s18, 128, %s2301_s23, %s1369_s13  }
 0x90d PF: > { %s2399_s29 = sld [smem:[#allocation17_spill]]  ;;  %s2400_s16 = sld [smem:[#allocation14_spill]] }
 0x90e   : > { %s2401_s15 = sld [smem:[#allocation19_spill]] }
 0x913   : > { %p1668_p0 = scmp.ge.s32.totalorder %s2399_s29, 2  ;;  %s1395_s28 = sand.u32 1, %s2400_s16  }
 0x914   : > { %p2402_p6 = scmp.ne.s32.totalorder %s2401_s15, 0  ;;  %s1396_s19 = scalar_lea.sflag [#allocation7], %s1395_s28 }
 0x916   : > { %p1663_p13 = pnand %p1668_p0, %p2402_p6 }
 0x918   : > { %1889 = dma.done.wait (!%p1663_p13), %s1396_s19, 128  }
 0x919   : > { %1891 = vsyncadd (!%p1663_p13), %s1396_s19, 4294967168  ;;  %s28_s30 = sadd.s32 1, %s2399_s29   ;;  %s2403_s17 = sld [smem:[#allocation15_spill]] }
 0x91a   : > { %p25_p2 = scmp.ge.s32.totalorder %s28_s30, 4   ;;  %s2404_s27 = sld [smem:[#allocation20_spill]] }
 0x91b   : > { %s2405_s28 = sld [smem:[#allocation16_spill]]  ;;  %s2406_s29 = sld [smem:[#allocation18_spill]] }
 0x91c   : > { %s2407_s25 = smov %s1898_s26  ;;  %27 = sbr.rel (!%p25_p2) target bundleno = 8 (0x8), region = 119 }
 0x91f   : > { %s2408_s26 = smov %s2403_s17 }
 0x923   :  { %1401 = vsyncpa [#allocation6], 1 }
 0x924   :  { %1403 = vsyncpa [#allocation6 + $0x1], 1 }
 0x925   :  { %1404 = vsyncpa [#allocation9], 1 }
 0x926   :  { %1405 = vsyncpa [#allocation7], 1 }
 0x927   :  { %1407 = vsyncpa [#allocation7 + $0x1], 1 }

// kernel: tpu_custom_call.1
= control target key start
LH: loop header
LB: loop body
LE: loop exit
PB: predicated region body
PF: predicated region fallthrough
CT: control target
= control target key end

     0   :  { %s2393_s0 = inlined_call_operand.hbm [shape: bf16[2,8,32], index: 0, kind: input, shape index: {}]   ;;  %s2394_s1 = inlined_call_operand.vmem [shape: bf16[32,32], index: 1, kind: input, shape index: {}]   ;;  %s2395_s2 = inlined_call_operand.vmem [shape: f32[1,32], index: 2, kind: input, shape index: {}]   ;;  %s2396_s3 = inlined_call_operand.vmem [shape: bf16[32,64], index: 3, kind: input, shape index: {}]   ;;  %s2397_s4 = inlined_call_operand.vmem [shape: f32[1,64], index: 4, kind: input, shape index: {}]   ;;  %s2398_s5 = inlined_call_operand.vmem [shape: bf16[32,32], index: 5, kind: input, shape index: {}]   ;;  %s2399_s6 = inlined_call_operand.vmem [shape: f32[1,32], index: 6, kind: input, shape index: {}]   ;;  %s2400_s7 = inlined_call_operand.hbm [shape: bf16[32,64], index: 7, kind: input, shape index: {}]   ;;  %s2401_s8 = inlined_call_operand.vmem [shape: f32[1,64], index: 8, kind: input, shape index: {}]   ;;  %s2402_s9 = inlined_call_operand.vmem [shape: bf16[64,32], index: 9, kind: input, shape index: {}]   ;;  %s2403_s10 = inlined_call_operand.vmem [shape: f32[1,32], index: 10, kind: input, shape index: {}]   ;;  %s2404_s11 = inlined_call_operand.vmem [shape: f32[1,32], index: 11, kind: input, shape index: {}]   ;;  %s2405_s12 = inlined_call_operand.vmem [shape: f32[1,32], index: 12, kind: input, shape index: {}]   ;;  %s2406_s13 = inlined_call_operand.hbm [shape: f32[2,8,32], index: 13, kind: output, shape index: {}]  }
   0x1   :  { %2415 = sst [smem:[#allocation18_spill]] %s2393_s0 }
   0x2   :  { %2416 = sst [smem:[#allocation19_spill]] %s2394_s1 }
   0x3   :  { %2417 = sst [smem:[#allocation20_spill]] %s2400_s7 }
   0x4   :  { %2418 = sst [smem:[#allocation21_spill]] %s2404_s11 }
   0x5   :  { %2419 = sst [smem:[#allocation22_spill]] %s2405_s12 }
   0x6   :  { %2420 = sst [smem:[#allocation23_spill]] %s2406_s13 }
   0x7   :  { %18 = vsyncpa [#allocation6], 0 }
   0x8   :  { %20 = vsyncpa [#allocation6 + $0x1], 0 }
   0x9   :  { %21 = vsyncpa [#allocation9], 0 }
   0xa   :  { %22 = vsyncpa [#allocation7], 0 }
   0xb   :  { %24 = vsyncpa [#allocation7 + $0x1], 0  ;;  %s2033_s25 = smov 0   ;;  %s2035_s26 = smov 0  }
   0xc   :  { %s2037_s27 = smov 0   ;;  %s2039_s28 = smov 0  }
   0xd   :  { %s2041_s29 = smov 0   ;;  %s2043_s30 = smov 0  }
   0xe LB: > { %2421 = sst [smem:[#allocation14_spill]] %s1924_s25  ;;  %s1491_s14 = sadd.s32 4294967295, %s1944_s30   ;;  %s1944_s30 = sphi %s2043_s30, %s30_s30   ;;  %s1940_s29 = sphi %s2041_s29, %s2455_s29   ;;  %s1936_s28 = sphi %s2039_s28, %s2454_s28   ;;  %s1932_s27 = sphi %s2037_s27, %s2453_s27   ;;  %s1928_s26 = sphi %s2035_s26, %s2452_s26   ;;  %s1924_s25 = sphi %s2033_s25, %s2451_s25  }
   0xf   : > { %2422 = sst [smem:[#allocation15_spill]] %s1936_s28  ;;  %s1492_s15 = sadd.s32 4294967294, %s1944_s30  }
  0x10   : > { %p62_p0 = scmp.ne.s32.totalorder %s1928_s26, %s1924_s25  ;;  %p2067_p1 = scmp.eq.s32.totalorder %s1491_s14, 0 }
  0x11   : > { %p2071_p2 = scmp.eq.s32.totalorder %s1491_s14, 1  ;;  %p346_p3 = scmp.eq.s32.totalorder %s1492_s15, 1 }
  0x12   : > { %s2423_s16 = scalar_select %p2067_p1, 1, 0 }
  0x13   : > { %s2424_s17 = scalar_select %p2071_p2, 1, 0 }
  0x14   : > { %p2077_p4 = por %p2067_p1, %p62_p0  ;;  %p1493_p5 = scmp.ge.s32.totalorder %s1944_s30, 1 }
  0x15   : > { %p2082_p6 = por %p346_p3, %p62_p0  ;;  %p353_p7 = scmp.lt.s32.totalorder %s1944_s30, 3 }
  0x16   : > { %s2425_s18 = scalar_select %p2077_p4, 1, 0 }
  0x17   : > { %s2426_s19 = scalar_select %p2082_p6, 1, 0 }
  0x18   : > { %p2087_p8 = pnand %p1493_p5, %p353_p7  ;;  %s1946_s21 = smov [#allocation8]  }
  0x19   : > { %2427 = sst [smem:[#allocation16_spill]] %s2426_s19  ;;  %s383_s22 = sshll.u32 %s1946_s21, 4  ;;  %s384_s22 = int_to_ptr.vmem [resolvable:$true] %s383_s22 }
  0x1a   : > { %s2428_s20 = scalar_select %p2087_p8, 1, 0 }
  0x1b   : > { %p1684_p9 = pneg %p2087_p8  ;;  %s42_s24 = sadd.s32 1, %s1940_s29 }
  0x1c   : > { %s2430_s7 = sld [smem:[#allocation20_spill]] }
  0x1d   : > { %p2096_p11 = pnand %p1684_p9, %p2067_p1 }
  0x1f   : > { %p1802_p13 = pneg %p2096_p11 }
  0x22   : > { %s1800_s19 = scalar_lea.hbm %s2430_s7, 256 }
  0x23   : > { %p1801_p12 = scmp.ne.s32.totalorder %s2430_s7, %s1800_s19  ;;  %p1807_p5 = scmp.lt.u32.totalorder %s1800_s19, %s2430_s7 }
  0x25   : > { %p1803_p0 = pnand %p1802_p13, %p1801_p12 }
  0x27   : > { %p1804_p3 = pneg %p1803_p0 }
  0x29   : > { %p1809_p7 = pnand %p1807_p5, %p1804_p3 }
  0x2b   : > { %1812 = shalt.err (!%p1809_p7)
}
  0x2c   : > { %s1813_s11 = scalar_lea.vmem %s384_s22, 256  ;;  %p1821_p1 = scmp.lt.s32.totalorder %s384_s22, %s384_s22 }
  0x2d   : > { %p1814_p9 = scmp.ne.s32.totalorder %s384_s22, %s1813_s11  ;;  %p1822_p4 = scmp.lt.s32.totalorder %s1813_s11, %s1813_s11 }
  0x2f   : > { %p1816_p10 = pnand %p1814_p9, %p1802_p13  ;;  %p1823_p8 = por %p1822_p4, %p1821_p1 }
  0x31   : > { %p1817_p6 = pneg %p1816_p10 }
  0x33   : > { %p1824_p2 = pnand %p1823_p8, %p1817_p6 }
  0x35   : > { %1827 = shalt.err (!%p1824_p2)
}
  0x36   : > { %s1947_s13 = smov 64   ;;  %s1948_s12 = smov 4  }
  0x37   : > { %1687 = dma.hbm_to_vmem [thread:$0]  (!%p2096_p11), %s2430_s7, 256, %s384_s22, [#allocation9], %s1947_s13, %s1947_s13, %s1948_s12  }
  0x38   : > { %p44_p1 = scmp.ge.s32.totalorder %s42_s24, 2  ;;  %s49_s11 = sadd.s32 1, %s1932_s27 }
  0x39   : > { %p56_p2 = scmp.ne.s32.totalorder %s1932_s27, %s1928_s26  ;;  %p57_p4 = scmp.eq.s32.totalorder %s1944_s30, 0 }
  0x3a   : > { %s2457_s24 = smov (%p44_p1, %s42_s24), 0  ;;  %p2433_p8 = scmp.ne.s32.totalorder %s2424_s17, 0 }
  0x3b   : > { %2431 = sst [smem:[#allocation17_spill]] %s2457_s24  ;;  %p2123_p6 = por %p57_p4, %p56_p2 }
  0x3c   : > { %p2129_p10 = por %p2433_p8, %p56_p2  ;;  %s46_s23 = ssub.s32 %s1940_s29, %s2457_s24 }
  0x3d   : > { %p1697_p12 = scmp.lt.s32.totalorder %s1944_s30, 2  ;;  %p47_p11 = scmp.eq.s32.totalorder %s46_s23, 0 }
  0x3e   : > { %s412_s22 = sand.u32 1, %s1932_s27   ;;  %s1497_s12 = sshll.u32 %s1940_s29, 6 }
  0x3f   : > { %s1496_s21 = sshll.u32 %s412_s22, 2  ;;  %s2435_s0 = sld [smem:[#allocation18_spill]] }
  0x40   : > { %s2138_s13 = scalar_select %p47_p11, %s1932_s27, %s49_s11  }
  0x41   : > { %s416_s17 = scalar_lea.vmem [#allocation5], %s1496_s21  ;;  %p2150_p13 = pnand %p1697_p12, %p2123_p6 }
  0x42   : > { %s423_s28 = sshll.u32 %s416_s17, 4  ;;  %s413_s11 = scalar_lea.sflag [#allocation6], %s412_s22  ;;  %s2146_s28 = int_to_ptr.vmem [resolvable:$true] %s423_s28 }
  0x43   : > { %p1830_p3 = pneg %p2150_p13 }
  0x45   : > { %s2144_s7 = scalar_lea.hbm %s2435_s0, %s1497_s12  ;;  %s1833_s25 = scalar_lea.hbm %s2435_s0, 128 }
  0x46   : > { %s1828_s24 = scalar_lea.hbm %s2144_s7, 64  ;;  %p1834_p9 = scmp.lt.u32.totalorder %s2144_s7, %s2435_s0 }
  0x47   : > { %p1829_p0 = scmp.ne.s32.totalorder %s2144_s7, %s1828_s24  ;;  %p1835_p1 = scmp.lt.u32.totalorder %s1833_s25, %s1828_s24 }
  0x48   : > { %p1837_p4 = scmp.lt.u32.totalorder %s1828_s24, %s2144_s7 }
  0x49   : > { %p1831_p5 = pnand %p1830_p3, %p1829_p0  ;;  %p1836_p2 = por %p1835_p1, %p1834_p9 }
  0x4b   : > { %p1832_p7 = pneg %p1831_p5  ;;  %p1838_p6 = por %p1837_p4, %p1836_p2 }
  0x4d   : > { %p1839_p8 = pnand %p1838_p6, %p1832_p7 }
  0x4f   : > { %1842 = shalt.err (!%p1839_p8)
}
  0x50   : > { %s1843_s22 = scalar_lea.vmem %s2146_s28, 64  ;;  %s1949_s17 = smov [#allocation5]  }
  0x51   : > { %p1844_p12 = scmp.ne.s32.totalorder %s2146_s28, %s1843_s22  ;;  %s1848_s21 = sshll.u32 %s1949_s17, 4  ;;  %s1849_s21 = int_to_ptr.vmem [resolvable:$false] %s1848_s21 }
  0x52   : > { %s1850_s12 = scalar_lea.vmem %s1849_s21, 128  ;;  %p1851_p5 = scmp.lt.s32.totalorder %s2146_s28, %s1849_s21 }
  0x53   : > { %p1846_p11 = pnand %p1844_p12, %p1830_p3  ;;  %p1852_p9 = scmp.lt.s32.totalorder %s1850_s12, %s1843_s22 }
  0x55   : > { %p1847_p0 = pneg %p1846_p11  ;;  %p1853_p1 = por %p1852_p9, %p1851_p5 }
  0x57   : > { %p1854_p2 = pnand %p1853_p1, %p1847_p0 }
  0x59   : > { %1857 = shalt.err (!%p1854_p2)
}
  0x5a   : > { %1691 = dma.hbm_to_vmem [thread:$0]  (!%p2150_p13), %s2144_s7, 64, %s2146_s28, %s413_s11  }
  0x5b   : > { %p2437_p7 = scmp.ne.s32.totalorder %s2428_s20, 0 }
  0x5c   : > { %s2182_s24 = sand.u32 (!%p2437_p7), 1, %s1928_s26   ;;  %p2438_p3 = scmp.ne.s32.totalorder (!%p2437_p7), %s2425_s18, 0 }
  0x5d   : > { %432 = sbr.rel (%p2437_p7) target bundleno = 2330 (0x91a), region = 72  ;;  %s1499_s25 = sshll.u32 (!%p2437_p7), %s2182_s24, 2 }
  0x5e   : > { %s435_s14 = scalar_lea.sflag (!%p2437_p7), [#allocation6], %s2182_s24  ;;  %s438_s19 = scalar_lea.vmem (!%p2437_p7), [#allocation5], %s1499_s25 }
  0x64   : > { %1911 = dma.done.wait (%p2438_p3), %s435_s14, 64  }
  0x65   : > { %1913 = vsyncadd (%p2438_p3), %s435_s14, 4294967232  ;;  %p2439_p4 = scmp.ne.s32.totalorder %s2423_s16, 0 }
  0x67   : > { %1915 = dma.done.wait (%p2439_p4), [#allocation9], 256  }
  0x68   : > { %1917 = vsyncadd (%p2439_p4), [#allocation9], 4294967040  ;;  %v1950_v0 = vmov 0.0   ;;  %vm1951_vm0 = vmmov 0   ;;  %v1763_v1 = vld [vmem:[%s2396_s3] sm:$0xff]   ;;  %v1764_v2 = vld [vmem:[%s2396_s3 + $0x8] sm:$0xff]  }
  0x69   : > { %1584 = vmatprep.subr.bf16.mxu1 %v1950_v0  ;;  %1588 = vmatprep.mubr.msk.bf16.mxu1 %vm1951_vm0, %v1950_v0  ;;  %v490_v3 = vld [vmem:[%s438_s19] sm:$0xf]  ;;  %vm514_vm1 = vcmask 261120   ;;  %s2440_s1 = sld [smem:[#allocation19_spill]]  ;;  %v1502_v7 = vld [vmem:[%s2397_s4] ss:$0 sm:$0xff] }
  0x6a   : > { %1600 = vmatprep.subr.bf16.mxu0 %v1950_v0  ;;  %1602 = vmatprep.mubr.msk.bf16.mxu0 %vm1951_vm0, %v1950_v0  ;;  %v566_v6 = vld [vmem:[%s438_s19] sm:$0xf]  ;;  %vm559_vm2 = vcmask 519168   ;;  %v1506_v14 = vld [vmem:[%s2395_s2] ss:$0 sm:$0xff]  ;;  %vm635_vm3 = vcmask 257024  }
  0x6b   : > { %1585 = vmatpush3.bf16.msra.mxu1 %v1763_v1  ;;  %vm639_vm4 = vcmask 64512   ;;  %s1952_s14 = smov 112   ;;  %s1953_s19 = smov 120   ;;  %vm706_vm5 = vcmask 1043456   ;;  %vm751_vm6 = vcmask 60416   ;;  %vm878_vm7 = vcmask 126016  }
  0x6c   : > { %1586 = vmatprep.subr.bf16.mxu1 %v1950_v0  ;;  %s1954_s7 = smov 104   ;;  %s1955_s28 = smov 96   ;;  %vm1005_vm8 = vcmask 191616   ;;  %vm1132_vm9 = vcmask 257216   ;;  %vm1309_vm10 = vcmask 523264  }
  0x6d   : > { %s1956_s18 = smov 80   ;;  %s1957_s16 = smov 72  }
  0x6e   : > { %s1958_s20 = smov 88   ;;  %s1959_s23 = smov 8  }
  0x6f   : > { %v1765_v4 = vld [vmem:[%s2440_s1] sm:$0xff]   ;;  %1587 = vmatpush3.bf16.msra.mxu1 %v1764_v2  ;;  %v1766_v5 = vld [vmem:[%s2440_s1 + $0x8] sm:$0xff]   ;;  %s1960_s12 = smov 16   ;;  %s1961_s25 = smov 24  }
  0x70   : > { %1592 = vmatprep.subr.bf16.mxu1 %v1950_v0 }
  0x72   : > { %1589 = vmatmul.mubr.msk.bf16.vlgmr.msra.gmra.mrb[0].mxu1 %vm514_vm1, %v490_v3 }
  0x73   : > { %1593 = vmatpush3.bf16.msra.mxu1 %v1765_v4  ;;  %1596 = vmatprep.mubr.msk.bf16.mxu1 %vm1951_vm0, %v1950_v0 }
  0x74   : > { %1594 = vmatprep.subr.bf16.mxu1 %v1950_v0 }
  0x77   : > { %1595 = vmatpush3.bf16.msra.mxu1 %v1766_v5 }
  0x78   : > { %1606 = vmatprep.subr.bf16.mxu1 %v1950_v0 }
  0x7a   : > { %1597 = vmatmul.mubr.msk.bf16.vlgmr.msra.gmra.mrb[4].mxu1 %vm514_vm1, %v566_v6 }
  0x7b   : > { %1608 = vmatprep.mubr.msk.bf16.mxu1 %vm1951_vm0, %v1950_v0 }
 0x145   : > { %v552_v8 = vpop.f32.mrb[0].mxu1 }
 0x146   : > { %v553_v9 = vadd.f32 %v1502_v7, %v552_v8  ;;  %v1590_v10 = vpop.f32.mrb[1].mxu1 }
 0x147   : > { %v555_v11 = vpop.f32.mrb[2].mxu1 }
 0x148   : > { %v558_v12 = vpack.c.bf16 %v553_v9, %v553_v9  ;;  %v1591_v13 = vpop.f32.mrb[3].mxu1 }
 0x14a   : > { %560 = vst.msk [vmem:[#allocation2] sm:$0xf] %vm559_vm2, %v558_v12 }
 0x14d   : > { %v628_v15 = vpop.f32.mrb[4].mxu1 }
 0x14e   : > { %v629_v16 = vadd.f32 %v1506_v14, %v628_v15  ;;  %v1598_v17 = vpop.f32.mrb[5].mxu1 }
 0x14f   : > { %v631_v18 = vpop.f32.mrb[6].mxu1 }
 0x150   : > { %v634_v19 = vpack.c.bf16 %v629_v16, %v629_v16  ;;  %v1599_v20 = vpop.f32.mrb[7].mxu1 }
 0x151   : > { %v2228_v21 = vld [vmem:[#allocation2] sm:$0xf] }
 0x152   : > { %v2230_v22 = vld [vmem:[#allocation2] ss:$0 sps:$4 sm:$0xff]   ;;  %636 = vst.msk [vmem:[#allocation3] sm:$0xf] %vm635_vm3, %v634_v19  ;;  %v644_v23 = vsel %vm639_vm4, %v2228_v21, 0  ;;  %v1511_v1 = vcombine.low %v2228_v21, %v2228_v21 }
 0x153   : > { %v2234_v24 = vld [vmem:[#allocation2] ss:$0 sps:$4 sm:$0xff]   ;;  %1601 = vmatpush3.bf16.xpose.msra.mxu0 %v644_v23  ;;  %890 = vrot.lane.b32.xlu1 %v2230_v22, %s1952_s14 }
 0x154   : > { %763 = vrot.lane.b32.xlu0 %v2234_v24, %s1953_s19  ;;  %1612 = vmatprep.subr.bf16.mxu0 %v1950_v0  ;;  %v2242_v29 = vld [vmem:[#allocation2] ss:$0 sps:$4 sm:$0xff]  }
 0x159   : > { %v637_v25 = vld [vmem:[#allocation3] sm:$0xf] }
 0x15a   : > { %v1770_v26 = vld [vmem:[#allocation3] ss:$0 sps:$4 sm:$0xff]   ;;  %1603 = vmatmul.mubr.msk.bf16.vlgmr.msra.gmra.mrb[0].mxu0 %vm639_vm4, %v637_v25 }
 0x15b   : > { %v1771_v27 = vld [vmem:[#allocation3] ss:$0 sps:$4 sm:$0xff]   ;;  %885 = vrot.lane.b32.xlu1 %v1770_v26, %s1952_s14  ;;  %1614 = vmatprep.mubr.msk.bf16.mxu0 %vm1951_vm0, %v1950_v0  ;;  %s2441_s14 = sld [smem:[#allocation15_spill]] }
 0x15c   : > { %758 = vrot.lane.b32.xlu0 %v1771_v27, %s1953_s19  ;;  %v1772_v28 = vld [vmem:[#allocation3] ss:$0 sps:$4 sm:$0xff]   ;;  %s1501_s19 = sshll.u32 %s2182_s24, 3 }
 0x15d   : > { %s484_s22 = scalar_lea.vmem [#allocation10], %s1501_s19 }
 0x15e   : > { %s1400_s17 = sshll.u32 %s484_s22, 4  ;;  %s2345_s17 = int_to_ptr.vmem [resolvable:$true] %s1400_s17 }
 0x15f   : > { %1012 = vrot.lane.b32.xlu1 %v1772_v28, %s1954_s7 }
 0x160   : > { %1017 = vrot.lane.b32.xlu0 %v2242_v29, %s1954_s7  ;;  %s1386_s7 = scalar_lea.sflag [#allocation7], %s2182_s24 }
 0x161   : > { %s1545_s11 = sshll.u32 %s2441_s14, 7  ;;  %s1962_s14 = smov [#allocation10]  }
 0x162   : > { %s1862_s19 = sshll.u32 %s1962_s14, 4  ;;  %s1863_s19 = int_to_ptr.vmem [resolvable:$false] %s1862_s19 }
 0x163   : > { %p1865_p12 = scmp.lt.s32.totalorder %s2345_s17, %s1863_s19 }
 0x1c5   : > { %v891_v32 = vpop.permute.xlu1 %890 }
 0x1c6   : > { %v764_v30 = vpop.permute.xlu0 %763  ;;  %v896_v34 = vsel %vm639_vm4, %v891_v32, 0 }
 0x1c7   : > { %v769_v31 = vsel %vm639_vm4, %v764_v30, 0 }
 0x1c8   : > { %1613 = vmatpush3.bf16.xpose.msra.mxu0 %v769_v31 }
 0x1c9   : > { %1624 = vmatprep.subr.bf16.mxu0 %v1950_v0 }
 0x1cd   : > { %v886_v36 = vpop.permute.xlu1 %885 }
 0x1ce   : > { %v759_v33 = vpop.permute.xlu0 %758 }
 0x1cf   : > { %1615 = vmatmul.mubr.msk.bf16.vlgmr.msra.gmra.mrb[4].mxu0 %vm639_vm4, %v759_v33 }
 0x1d0   : > { %1625 = vmatpush3.bf16.xpose.msra.mxu0 %v896_v34  ;;  %1626 = vmatprep.mubr.msk.bf16.mxu0 %vm1951_vm0, %v1950_v0 }
 0x1d1   : > { %1636 = vmatprep.subr.bf16.mxu0 %v1950_v0  ;;  %v1013_v38 = vpop.permute.xlu1 %1012 }
 0x1d2   : > { %v1018_v35 = vpop.permute.xlu0 %1017 }
 0x1d3   : > { %v1023_v37 = vsel %vm639_vm4, %v1018_v35, 0 }
 0x1d7   : > { %1627 = vmatmul.mubr.msk.bf16.vlgmr.msra.gmra.mrb[8].mxu0 %vm639_vm4, %v886_v36 }
 0x1d8   : > { %1637 = vmatpush3.bf16.xpose.msra.mxu0 %v1023_v37  ;;  %1638 = vmatprep.mubr.msk.bf16.mxu0 %vm1951_vm0, %v1950_v0 }
 0x1d9   : > { %1648 = vmatprep.subr.bf16.mxu0 %v1950_v0 }
 0x1df   : > { %1639 = vmatmul.mubr.msk.bf16.vlgmr.msra.gmra.mrb[12].mxu0 %vm639_vm4, %v1013_v38 }
 0x1e0   : > { %1652 = vmatprep.mubr.msk.bf16.mxu0 %vm1951_vm0, %v1950_v0 }
 0x22d   : > { %v680_v39 = vpop.f32.mrb[0].mxu0 }
 0x22e   : > { %v1604_v40 = vpop.f32.mrb[1].mxu0  ;;  %v686_v41 = vsel %vm639_vm4, %v680_v39, -inf }
 0x22f   : > { %687 = vmax.xlane.f32.xlu0 %v686_v41  ;;  %v683_v42 = vpop.f32.mrb[2].mxu0 }
 0x230   : > { %v1605_v43 = vpop.f32.mrb[3].mxu0 }
 0x2a2   : > { %v805_v44 = vpop.f32.mrb[4].mxu0 }
 0x2a3   : > { %v1616_v45 = vpop.f32.mrb[5].mxu0  ;;  %v811_v46 = vsel %vm639_vm4, %v805_v44, -inf }
 0x2a4   : > { %812 = vmax.xlane.f32.xlu1 %v811_v46  ;;  %v808_v47 = vpop.f32.mrb[6].mxu0 }
 0x2a5   : > { %v1617_v48 = vpop.f32.mrb[7].mxu0 }
 0x2aa   : > { %v932_v49 = vpop.f32.mrb[8].mxu0 }
 0x2ab   : > { %v1628_v50 = vpop.f32.mrb[9].mxu0  ;;  %v938_v51 = vsel %vm639_vm4, %v932_v49, -inf }
 0x2ac   : > { %939 = vmax.xlane.f32.xlu0 %v938_v51  ;;  %v935_v52 = vpop.f32.mrb[10].mxu0  ;;  %v1774_v51 = vld [vmem:[%s2398_s5] sm:$0xff]  }
 0x2ad   : > { %v1629_v53 = vpop.f32.mrb[11].mxu0  ;;  %1649 = vmatpush3.bf16.msra.mxu0 %v1774_v51 }
 0x2ae   : > { %v1775_v53 = vld [vmem:[%s2398_s5 + $0x8] sm:$0xff]   ;;  %1650 = vmatprep.subr.bf16.mxu0 %v1950_v0 }
 0x2b1   : > { %1651 = vmatpush3.bf16.msra.mxu0 %v1775_v53 }
 0x2b2   : > { %v1059_v54 = vpop.f32.mrb[12].mxu0  ;;  %1664 = vmatprep.subr.bf16.mxu0 %v1950_v0 }
 0x2b3   : > { %v1640_v55 = vpop.f32.mrb[13].mxu0  ;;  %v1065_v56 = vsel %vm639_vm4, %v1059_v54, -inf }
 0x2b4   : > { %1066 = vmax.xlane.f32.xlu0 %v1065_v56  ;;  %v1062_v57 = vpop.f32.mrb[14].mxu0 }
 0x2b5   : > { %v1641_v58 = vpop.f32.mrb[15].mxu0 }
 0x2b6   : > { %v1776_v58 = vld [vmem:[#allocation8] sm:$0xff]  }
 0x2bc   : > { %v688_v59 = vpop.xlane.xlu0 %687 }
 0x2bd   : > { %v689_v60 = vsub.f32 %v680_v39, %v688_v59 }
 0x2bf   : > { %v690_v61 = vmul.f32 1.442695, %v689_v60 }
 0x2c1   : > { %1782 = vpow2.f32 %v690_v61 }
 0x2cb   : > { %v1783_v62 = vpop.eup %1782 }
 0x2cc   : > { %v692_v63 = vsel %vm639_vm4, %v1783_v62, 0.0 }
 0x2cd   : > { %693 = vadd.xlane.f32.xlu1 %v692_v63 }
 0x2de   : > { %701 = vrot.lane.b32.xlu1 %v1511_v1, %s1955_s28  ;;  %s1858_s28 = scalar_lea.vmem %s2345_s17, 128 }
 0x2df   : > { %p1859_p13 = scmp.ne.s32.totalorder %s2345_s17, %s1858_s28 }
 0x2e1   : > { %p1860_p6 = pnand %p1859_p13, %p2129_p10 }
 0x2e3   : > { %p1861_p8 = pneg %p1860_p6 }
 0x331   : > { %v813_v2 = vpop.xlane.xlu1 %812 }
 0x332   : > { %v814_v3 = vsub.f32 %v805_v44, %v813_v2 }
 0x334   : > { %v815_v4 = vmul.f32 1.442695, %v814_v3 }
 0x336   : > { %1784 = vpow2.f32 %v815_v4 }
 0x339   : > { %v940_v5 = vpop.xlane.xlu0 %939 }
 0x33a   : > { %v941_v6 = vsub.f32 %v932_v49, %v940_v5  ;;  %v1777_v5 = vld [vmem:[#allocation8 + $0x8] sm:$0xff]  }
 0x33c   : > { %v942_v7 = vmul.f32 1.442695, %v941_v6  ;;  %v1778_v6 = vld [vmem:[%s2402_s9] sm:$0xff]  }
 0x33e   : > { %1786 = vpow2.f32 %v942_v7  ;;  %v1779_v7 = vld [vmem:[%s2402_s9 + $0x8] sm:$0xff]  }
 0x340   : > { %v1785_v8 = vpop.eup %1784 }
 0x341   : > { %v1067_v9 = vpop.xlane.xlu0 %1066  ;;  %v817_v10 = vsel %vm639_vm4, %v1785_v8, 0.0 }
 0x342   : > { %v1068_v11 = vsub.f32 %v1059_v54, %v1067_v9  ;;  %818 = vadd.xlane.f32.xlu0 %v817_v10 }
 0x344   : > { %v1069_v12 = vmul.f32 1.442695, %v1068_v11 }
 0x346   : > { %1788 = vpow2.f32 %v1069_v12 }
 0x348   : > { %v1787_v13 = vpop.eup %1786 }
 0x349   : > { %v944_v14 = vsel %vm639_vm4, %v1787_v13, 0.0 }
 0x34a   : > { %945 = vadd.xlane.f32.xlu1 %v944_v14 }
 0x350   : > { %v1789_v15 = vpop.eup %1788 }
 0x351   : > { %v1071_v16 = vsel %vm639_vm4, %v1789_v15, 0.0 }
 0x352   : > { %1072 = vadd.xlane.f32.xlu0 %v1071_v16  ;;  %v1781_v16 = vld [vmem:[%s2402_s9 + $0x18] sm:$0xff]  }
 0x35a   : > { %v694_v17 = vpop.xlane.xlu1 %693 }
 0x35b   : > { %1790 = vrcp.f32 %v694_v17  ;;  %950 = vrot.lane.b32.xlu1 %v2230_v22, %s1956_s18  ;;  %v1532_v17 = vld [vmem:[%s2401_s8] ss:$0 sm:$0xff]  ;;  %s2442_s18 = sld [smem:[#allocation21_spill]] }
 0x35e   : > { %v702_v18 = vpop.permute.xlu1 %701 }
 0x35f   : > { %v708_v19 = vsel %vm706_vm5, %v702_v18, 0  ;;  %1077 = vrot.lane.b32.xlu1 %v2242_v29, %s1957_s16 }
 0x360   : > { %1607 = vmatpush3.bf16.msra.mxu1 %v708_v19 }
 0x361   : > { %1618 = vmatprep.subr.bf16.mxu1 %v1950_v0 }
 0x365   : > { %v1791_v20 = vpop.eup %1790 }
 0x366   : > { %v696_v21 = vmul.f32 %v1791_v20, %v1783_v62 }
 0x368   : > { %823 = vrot.lane.b32.xlu0 %v2234_v24, %s1958_s20  ;;  %v697_v23 = vpack.c.bf16 %v696_v21, %v696_v21 }
 0x36a   : > { %1609 = vmatmul.mubr.msk.bf16.vlgmr.msra.gmra.mrb[8].mxu1 %vm639_vm4, %v697_v23 }
 0x36b   : > { %1620 = vmatprep.mubr.msk.bf16.mxu1 %vm1951_vm0, %v1950_v0 }
 0x3cf   : > { %v819_v22 = vpop.xlane.xlu0 %818 }
 0x3d0   : > { %1792 = vrcp.f32 %v819_v22 }
 0x3d7   : > { %v946_v25 = vpop.xlane.xlu1 %945 }
 0x3d8   : > { %1794 = vrcp.f32 %v946_v25 }
 0x3da   : > { %v1793_v26 = vpop.eup %1792 }
 0x3db   : > { %v821_v28 = vmul.f32 %v1793_v26, %v1785_v8  ;;  %v951_v31 = vpop.permute.xlu1 %950  ;;  %v1528_v8 = vld [vmem:[%s2399_s6] ss:$0 sm:$0xff] }
 0x3dc   : > { %v956_v33 = vsel %vm706_vm5, %v951_v31, 0 }
 0x3dd   : > { %v822_v24 = vpack.c.bf16 %v821_v28, %v821_v28 }
 0x3df   : > { %v1073_v27 = vpop.xlane.xlu0 %1072  ;;  %v1078_v35 = vpop.permute.xlu1 %1077 }
 0x3e0   : > { %1796 = vrcp.f32 %v1073_v27  ;;  %v1083_v38 = vsel %vm706_vm5, %v1078_v35, 0 }
 0x3e2   : > { %v1795_v32 = vpop.eup %1794 }
 0x3e3   : > { %v824_v29 = vpop.permute.xlu0 %823  ;;  %v948_v34 = vmul.f32 %v1795_v32, %v1787_v13 }
 0x3e4   : > { %v829_v30 = vsel %vm706_vm5, %v824_v29, 0 }
 0x3e5   : > { %1619 = vmatpush3.bf16.msra.mxu1 %v829_v30  ;;  %v949_v36 = vpack.c.bf16 %v948_v34, %v948_v34 }
 0x3e6   : > { %1630 = vmatprep.subr.bf16.mxu1 %v1950_v0 }
 0x3e8   : > { %1621 = vmatmul.mubr.msk.bf16.vlgmr.msra.gmra.mrb[12].mxu1 %vm639_vm4, %v822_v24 }
 0x3e9   : > { %1631 = vmatpush3.bf16.msra.mxu1 %v956_v33  ;;  %1632 = vmatprep.mubr.msk.bf16.mxu1 %vm1951_vm0, %v1950_v0 }
 0x3ea   : > { %1642 = vmatprep.subr.bf16.mxu1 %v1950_v0  ;;  %v1797_v37 = vpop.eup %1796 }
 0x3eb   : > { %v1075_v39 = vmul.f32 %v1797_v37, %v1789_v15  ;;  %v1780_v15 = vld [vmem:[%s2402_s9 + $0x10] sm:$0xff]  }
 0x3ed   : > { %v1076_v40 = vpack.c.bf16 %v1075_v39, %v1075_v39 }
 0x3f0   : > { %1633 = vmatmul.mubr.msk.bf16.vlgmr.msra.gmra.mrb[16].mxu1 %vm639_vm4, %v949_v36 }
 0x3f1   : > { %1643 = vmatpush3.bf16.msra.mxu1 %v1083_v38  ;;  %1644 = vmatprep.mubr.msk.bf16.mxu1 %vm1951_vm0, %v1950_v0 }
 0x3f2   : > { %1656 = vmatprep.subr.bf16.mxu1 %v1950_v0 }
 0x3f8   : > { %1645 = vmatmul.mubr.msk.bf16.vlgmr.msra.gmra.mrb[20].mxu1 %vm639_vm4, %v1076_v40 }
 0x3f9   : > { %1660 = vmatprep.mubr.msk.bf16.mxu1 %vm1951_vm0, %v1950_v0  ;;  %1657 = vmatpush3.bf16.msra.mxu1 %v1776_v58 }
 0x3fa   : > { %1658 = vmatprep.subr.bf16.mxu1 %v1950_v0 }
 0x3fd   : > { %1659 = vmatpush3.bf16.msra.mxu1 %v1777_v5 }
 0x43d   : > { %v744_v41 = vpop.f32.mrb[8].mxu1 }
 0x43e   : > { %v750_v42 = vpack.c.bf16 %v744_v41, %v744_v41  ;;  %v1610_v43 = vpop.f32.mrb[9].mxu1  ;;  %v1542_v41 = vld [vmem:[%s2442_s18] ss:$0 sm:$0xff]  ;;  %s1864_s18 = scalar_lea.vmem %s1863_s19, 256 }
 0x43f   : > { %v747_v44 = vpop.f32.mrb[10].mxu1  ;;  %p1866_p11 = scmp.lt.s32.totalorder %s1864_s18, %s1858_s28 }
 0x440   : > { %752 = vst.msk [vmem:[#allocation4] sm:$0xf] %vm751_vm6, %v750_v42  ;;  %v1611_v45 = vpop.f32.mrb[11].mxu1 }
 0x441   : > { %p1867_p0 = por %p1866_p11, %p1865_p12 }
 0x443   : > { %p1868_p5 = pnand %p1867_p0, %p1861_p8 }
 0x4bb   : > { %v865_v46 = vpop.f32.mrb[12].mxu1 }
 0x4bc   : > { %v1548_v47 = vpack.c.bf16 %v865_v46, %v865_v46  ;;  %v1622_v48 = vpop.f32.mrb[13].mxu1 }
 0x4bd   : > { %v868_v49 = vpop.f32.mrb[14].mxu1 }
 0x4be   : > { %875 = vrot.lane.b32.xlu0 %v1548_v47, %s1959_s23  ;;  %v1623_v50 = vpop.f32.mrb[15].mxu1  ;;  %s2443_s23 = sld [smem:[#allocation22_spill]] }
 0x4c3   : > { %v992_v52 = vpop.f32.mrb[16].mxu1 }
 0x4c4   : > { %v1549_v54 = vpack.c.bf16 %v992_v52, %v992_v52  ;;  %v1634_v55 = vpop.f32.mrb[17].mxu1  ;;  %v1543_v43 = vld [vmem:[%s2443_s23] ss:$0 sm:$0xff] }
 0x4c5   : > { %v995_v56 = vpop.f32.mrb[18].mxu1 }
 0x4c6   : > { %1002 = vrot.lane.b32.xlu1 %v1549_v54, %s1960_s12  ;;  %v1635_v57 = vpop.f32.mrb[19].mxu1 }
 0x4cb   : > { %v1119_v59 = vpop.f32.mrb[20].mxu1 }
 0x4cc   : > { %v1550_v60 = vpack.c.bf16 %v1119_v59, %v1119_v59  ;;  %v1646_v61 = vpop.f32.mrb[21].mxu1 }
 0x4cd   : > { %v1122_v62 = vpop.f32.mrb[22].mxu1 }
 0x4ce   : > { %1129 = vrot.lane.b32.xlu0 %v1550_v60, %s1961_s25  ;;  %v1647_v63 = vpop.f32.mrb[23].mxu1  ;;  %s2444_s25 = sld [smem:[#allocation23_spill]] }
 0x4d4   : > { %s2445_s0 = smov %s2444_s25  ;;  %s2343_s1 = scalar_lea.hbm %s2444_s25, %s1545_s11 }
 0x530   : > { %v876_v1 = vpop.permute.xlu0 %875 }
 0x531   : > { %879 = vst.msk [vmem:[#allocation4] sm:$0xf] %vm878_vm7, %v876_v1 }
 0x538   : > { %v1003_v2 = vpop.permute.xlu1 %1002 }
 0x539   : > { %1006 = vst.msk [vmem:[#allocation4] sm:$0xf] %vm1005_vm8, %v1003_v2 }
 0x540   : > { %v1130_v3 = vpop.permute.xlu0 %1129 }
 0x541   : > { %1133 = vst.msk [vmem:[#allocation4] sm:$0xf] %vm1132_vm9, %v1130_v3 }
 0x548   : > { %v1134_v4 = vld [vmem:[#allocation4] sm:$0xf] }
 0x549   : > { %1653 = vmatmul.mubr.msk.bf16.vlgmr.msra.gmra.mrb[16].mxu0 %vm514_vm1, %v1134_v4 }
 0x54a   : > { %1672 = vmatprep.mubr.msk.bf16.mxu0 %vm1951_vm0, %v1950_v0  ;;  %1665 = vmatpush3.bf16.msra.mxu0 %v1778_v6 }
 0x54b   : > { %1666 = vmatprep.subr.bf16.mxu0 %v1950_v0 }
 0x54e   : > { %1667 = vmatpush3.bf16.msra.mxu0 %v1779_v7 }
 0x54f   : > { %1668 = vmatprep.subr.bf16.mxu0 %v1950_v0 }
 0x552   : > { %1669 = vmatpush3.bf16.msra.mxu0 %v1780_v15 }
 0x553   : > { %1670 = vmatprep.subr.bf16.mxu0 %v1950_v0  ;;  %v1536_v0 = vld [vmem:[%s2403_s10] ss:$0 sm:$0xff] }
 0x556   : > { %1671 = vmatpush3.bf16.msra.mxu0 %v1781_v16 }
 0x61c   : > { %v1195_v9 = vpop.f32.mrb[16].mxu0 }
 0x61d   : > { %v1196_v10 = vadd.f32 %v1528_v8, %v1195_v9  ;;  %v1654_v11 = vpop.f32.mrb[17].mxu0 }
 0x61e   : > { %v1198_v12 = vpop.f32.mrb[18].mxu0 }
 0x61f   : > { %v1201_v13 = vpack.c.bf16 %v1196_v10, %v1196_v10  ;;  %v1655_v14 = vpop.f32.mrb[19].mxu0 }
 0x621   : > { %1661 = vmatmul.mubr.msk.bf16.vlgmr.msra.gmra.mrb[24].mxu1 %vm514_vm1, %v1201_v13 }
 0x6f4   : > { %v1262_v18 = vpop.f32.mrb[24].mxu1 }
 0x6f5   : > { %v1263_v19 = vadd.f32 %v1532_v17, %v1262_v18  ;;  %v1662_v20 = vpop.f32.mrb[25].mxu1 }
 0x6f6   : > { %v1265_v21 = vpop.f32.mrb[26].mxu1 }
 0x6f7   : > { %v1268_v23 = vmax.f32 %v1263_v19, 0.0  ;;  %v1663_v22 = vpop.f32.mrb[27].mxu1 }
 0x6f9   : > { %v1269_v25 = vpack.c.bf16 %v1268_v23, %v1268_v23 }
 0x6fb   : > { %1673 = vmatmul.mubr.msk.bf16.vlgmr.msra.gmra.mrb[20].mxu0 %vm1309_vm10, %v1269_v25 }
 0x7ce   : > { %v1347_v26 = vpop.f32.mrb[20].mxu0 }
 0x7cf   : > { %v1348_v27 = vadd.f32 %v1536_v0, %v1347_v26  ;;  %v1674_v28 = vpop.f32.mrb[21].mxu0 }
 0x7d0   : > { %v1350_v29 = vpop.f32.mrb[22].mxu0 }
 0x7d1   : > { %v1675_v30 = vpop.f32.mrb[23].mxu0  ;;  %v1353_v31 = vadd.f32 %v1348_v27, %v1196_v10 }
 0x7d3   : > { %v1354_v24 = vsel %vm514_vm1, %v1353_v31, 0.0 }
 0x7d4   : > { %1355 = vadd.xlane.f32.xlu1 %v1354_v24 }
 0x861   : > { %v1356_v32 = vpop.xlane.xlu1 %1355 }
 0x862   : > { %v1358_v33 = vmul.f32 0.03125, %v1356_v32 }
 0x864   : > { %v1359_v34 = vsub.f32 %v1353_v31, %v1358_v33 }
 0x866   : > { %v1360_v35 = vmul.f32 %v1359_v34, %v1359_v34 }
 0x868   : > { %v1361_v36 = vsel %vm514_vm1, %v1360_v35, 0.0 }
 0x869   : > { %1362 = vadd.xlane.f32.xlu0 %v1361_v36 }
 0x8f6   : > { %v1363_v37 = vpop.xlane.xlu0 %1362 }
 0x8f7   : > { %v1364_v38 = vmul.f32 0.03125, %v1363_v37 }
 0x8f9   : > { %v1365_v39 = vadd.f32 1e-06, %v1364_v38 }
 0x8fb   : > { %1798 = vrsqrt.f32 %v1365_v39 }
 0x905   : > { %v1799_v40 = vpop.eup %1798 }
 0x906   : > { %v1367_v42 = vmul.f32 %v1799_v40, %v1359_v34 }
 0x908   : > { %v1375_v44 = vmul.f32 %v1542_v41, %v1367_v42 }
 0x90a   : > { %v1383_v45 = vadd.f32 %v1543_v43, %v1375_v44 }
 0x90c   : > { %1384 = vst.msk [vmem:[%s484_s22] sm:$0xff] %vm514_vm1, %v1383_v45 }
 0x90d   : > { %1871 = shalt.err (!%p1868_p5)
}
 0x90e   : > { %s1872_s24 = scalar_lea.hbm %s2343_s1, 128  ;;  %s1876_s23 = scalar_lea.hbm %s2445_s0, 256 }
 0x90f   : > { %p1873_p9 = scmp.ne.s32.totalorder %s2343_s1, %s1872_s24  ;;  %p1877_p7 = scmp.lt.u32.totalorder %s2343_s1, %s2445_s0 }
 0x910   : > { %p1878_p3 = scmp.lt.u32.totalorder %s1876_s23, %s1872_s24  ;;  %p1880_p13 = scmp.lt.u32.totalorder %s1872_s24, %s2343_s1 }
 0x911   : > { %p1874_p1 = pnand %p1873_p9, %p2129_p10 }
 0x912   : > { %p1879_p4 = por %p1878_p3, %p1877_p7 }
 0x913   : > { %p1875_p2 = pneg %p1874_p1 }
 0x914   : > { %p1881_p6 = por %p1880_p13, %p1879_p4 }
 0x916   : > { %p1882_p8 = pnand %p1881_p6, %p1875_p2 }
 0x918   : > { %1885 = shalt.err (!%p1882_p8)
}
 0x919   : > { %1682 = dma.vmem_to_hbm [thread:$0]  (%p2129_p10), %s2345_s17, 128, %s2343_s1, %s1386_s7  }
 0x91a PF: > { %s2446_s21 = sld [smem:[#allocation14_spill]]  ;;  %s2447_s12 = sld [smem:[#allocation16_spill]] }
 0x91b   : > { %p2449_p11 = scmp.ge.s32.totalorder %s1944_s30, 2 }
 0x920   : > { %s1412_s25 = sand.u32 1, %s2446_s21   ;;  %p2448_p12 = scmp.ne.s32.totalorder %s2447_s12, 0 }
 0x921   : > { %s1413_s28 = scalar_lea.sflag [#allocation7], %s1412_s25 }
 0x922   : > { %p1693_p0 = pnand %p2449_p11, %p2448_p12 }
 0x924   : > { %1919 = dma.done.wait (!%p1693_p0), %s1413_s28, 128  }
 0x925   : > { %1921 = vsyncadd (!%p1693_p0), %s1413_s28, 4294967168  ;;  %s30_s30 = sadd.s32 1, %s1944_s30   ;;  %s2450_s15 = sld [smem:[#allocation17_spill]] }
 0x926   : > { %p27_p5 = scmp.ge.s32.totalorder %s30_s30, 4   ;;  %s2451_s25 = smov %s1928_s26 }
 0x927   : > { %s2452_s26 = smov %s1932_s27  ;;  %s2453_s27 = smov %s2138_s13 }
 0x928   : > { %s2454_s28 = smov %s1940_s29  ;;  %29 = sbr.rel (!%p27_p5) target bundleno = 14 (0xe), region = 126 }
 0x92b   : > { %s2455_s29 = smov %s2450_s15 }
 0x92f   :  { %1418 = vsyncpa [#allocation6], 1 }
 0x930   :  { %1420 = vsyncpa [#allocation6 + $0x1], 1 }
 0x931   :  { %1421 = vsyncpa [#allocation9], 1 }
 0x932   :  { %1422 = vsyncpa [#allocation7], 1 }
 0x933   :  { %1424 = vsyncpa [#allocation7 + $0x1], 1 }

</bundles_post_ra>
